<compile_context>
chip_gen: v5e
topology: v5e:2x2
jax: 0.10.0
libtpu: 0.0.40
codegen_flags: <defaults>
</compile_context>

<pallas_src>
import jax
import jax.numpy as jnp
from jax.experimental import pallas as pl
from jax.experimental.pallas import tpu as pltpu

EMBED = 64          # embedding_size
NUM_FEATURES = 9    # MoleculeNet ESOL node features
F_PAD = 16          # feature dim zero-padded for clean sublane layout
NUM_CLASSES = 1     # ESOL regression target


# ----------------------------------------------------------------------------
# Fused Pallas kernel: per super-block, 3x(GCN+tanh) -> max/mean pool -> head
# ----------------------------------------------------------------------------
def _fused_net_kernel(a_ref, x_ref, w0_ref, b0_ref, w1_ref, b1_ref,
                      w2_ref, b2_ref, pen_ref, mask_ref, invcnt_ref,
                      wout_ref, bout_ref, out_ref, hid_ref):
    a = a_ref[...]                              # (SB, SB) bf16, this block only
    num_graphs = mask_ref.shape[0]              # B graphs in this super-block
    sb = a_ref.shape[0]
    nodes_per_graph = sb // num_graphs

    def gcn(h_bf16, w_ref, b_ref):
        # tanh(A_hat @ (h @ W) + b); bf16 MXU dots, f32 accumulate + tanh.
        xw = jnp.dot(h_bf16, w_ref[...], preferred_element_type=jnp.float32)
        agg = jnp.dot(a, xw.astype(jnp.bfloat16),
                      preferred_element_type=jnp.float32)
        return jnp.tanh(agg + b_ref[...])

    h = gcn(x_ref[...], w0_ref, b0_ref)                     # initial_conv
    h = gcn(h.astype(jnp.bfloat16), w1_ref, b1_ref)         # conv1
    h = gcn(h.astype(jnp.bfloat16), w2_ref, b2_ref)         # conv2 (SB, E) f32

    # ---- global_mean_pool: one MXU pass; padded nodes excluded by the mask;
    #      scale by precomputed 1/count (no divide on the VALU path).
    hmean = jnp.dot(mask_ref[...], h.astype(jnp.bfloat16),
                    preferred_element_type=jnp.float32) * invcnt_ref[...]

    # ---- global_max_pool: contiguous per-graph node blocks (PyG batching).
    #      Additive penalty (-4 on padded rows, 0 on real rows) is safe since
    #      tanh output is in (-1, 1); reshape is layout-preserving because
    #      nodes_per_graph is a multiple of the 8-row sublane tile.
    h_pen = h + pen_ref[...]                                 # one VPU add
    e = h.shape[1]
    hmax = jnp.max(h_pen.reshape(num_graphs, nodes_per_graph, e), axis=1)

    hidden = jnp.concatenate([hmax, hmean], axis=1)          # (B, 2E) lane-dense
    hid_ref[...] = hidden

    # ---- Linear head (NUM_CLASSES == 1): VPU multiply + lane reduction
    #      instead of a nearly-empty (2E, 1) MXU pass.
    out_ref[...] = (jnp.sum(hidden * wout_ref[...], axis=1, keepdims=True)
                    + bout_ref[...])


def _resident(shape):
    # Grid-invariant block: DMA'd once, stays resident in VMEM for the grid.
    return pl.BlockSpec(shape, lambda i: (0, 0))


def fused_forward(a_blk, x_pad, w0, b0, w1, b1, w2, b2,
                  pad_pen, mask, inv_counts, w_out_row, b_out):
    sb = a_blk.shape[1]                    # node rows per super-block
    num_blocks = a_blk.shape[0] // sb      # grid extent
    b_total = mask.shape[0]
    b = b_total // num_blocks              # graphs per super-block
    e = w1.shape[1]
    c = b_out.shape[1]
    f = x_pad.shape[1]

    args = (a_blk, x_pad, w0, b0, w1, b1, w2, b2,
            pad_pen, mask, inv_counts, w_out_row, b_out)

    in_specs = [
        pl.BlockSpec((sb, sb), lambda i: (i, 0)),     # block-diag A_hat tile
        pl.BlockSpec((sb, f), lambda i: (i, 0)),      # node features
        _resident((f, e)), _resident((1, e)),         # w0, b0
        _resident((e, e)), _resident((1, e)),         # w1, b1
        _resident((e, e)), _resident((1, e)),         # w2, b2
        pl.BlockSpec((sb, 1), lambda i: (i, 0)),      # max-pool pad penalty
        pl.BlockSpec((b, sb), lambda i: (i, 0)),      # mean-pool mask
        pl.BlockSpec((b, 1), lambda i: (i, 0)),       # 1 / node counts
        _resident((1, 2 * e)), _resident((1, c)),     # head weight row, bias
    ]
    out_specs = (
        pl.BlockSpec((b, c), lambda i: (i, 0)),
        pl.BlockSpec((b, 2 * e), lambda i: (i, 0)),   # lane-dense (2E = 128)
    )

    flops_blk = (2 * sb * f * e + 2 * 2 * sb * e * e     # x @ W  (3 layers)
                 + 3 * 2 * sb * sb * e                   # A @ xw (3 layers)
                 + 2 * b * sb * e + 2 * b * 2 * e)       # mean pool + head
    bytes_accessed = (sum(int(x.size) * x.dtype.itemsize for x in args)
                      + b_total * (c + 2 * e) * 4)
    cost = pl.CostEstimate(flops=num_blocks * flops_blk,
                           transcendentals=num_blocks * 3 * sb * e,
                           bytes_accessed=int(bytes_accessed))

    return pl.pallas_call(
        _fused_net_kernel,
        out_shape=(jax.ShapeDtypeStruct((b_total, c), jnp.float32),
                   jax.ShapeDtypeStruct((b_total, 2 * e), jnp.float32)),
        grid=(num_blocks,),
        in_specs=in_specs,
        out_specs=out_specs,
        compiler_params=pltpu.CompilerParams(
            dimension_semantics=("parallel",),        # 2-TC sharding on v7x
            vmem_limit_bytes=32 * 1024 * 1024),       # per-block use << limit
        cost_estimate=cost,
    )(*args)


# ----------------------------------------------------------------------------
# Glue: per-super-block normalized adjacency, masks, counts
# ----------------------------------------------------------------------------
def build_norm_adj(edge_index, valid, n_pad):
    """A_hat = D^{-1/2}(A + I)D^{-1/2}; padded rows/cols stay exactly zero.

    Diagonal is forced to `valid` (add_remaining_self_loops semantics), so an
    explicit self-loop already present in edge_index is not double-counted.
    """
    src, dst = edge_index[0], edge_index[1]
    a = jnp.zeros((n_pad, n_pad), jnp.float32).at[src, dst].set(1.0)
    a = a * (1.0 - jnp.eye(n_pad, dtype=jnp.float32)) + jnp.diag(valid)
    deg = jnp.sum(a, axis=1)
    d_inv_sqrt = jnp.where(deg > 0, 1.0 / jnp.sqrt(deg), 0.0)
    return d_inv_sqrt[:, None] * a * d_inv_sqrt[None, :]


# ----------------------------------------------------------------------------
# Full forward pass (mirrors Net.forward; returns (out, hidden))
# ----------------------------------------------------------------------------
def net_forward(params, a_blk, x_pad, pad_pen, mask, inv_counts):
    bf = jnp.bfloat16
    return fused_forward(
        a_blk.astype(bf), x_pad.astype(bf),
        params["w0"].astype(bf), params["b0"],
        params["w1"].astype(bf), params["b1"],
        params["w2"].astype(bf), params["b2"],
        pad_pen, mask.astype(bf), inv_counts,
        params["w_out"].T,             # (1, 2E) row (NUM_CLASSES == 1)
        params["b_out"],
    )


def init_params(key):
    def glorot(k, shape):
        lim = (6.0 / (shape[0] + shape[1])) ** 0.5
        return jax.random.uniform(k, shape, jnp.float32, -lim, lim)

    ks = jax.random.split(key, 4)
    w0 = glorot(ks[0], (NUM_FEATURES, EMBED))
    w0 = jnp.pad(w0, ((0, F_PAD - NUM_FEATURES), (0, 0)))   # zero rows: inert
    return {
        "w0": w0,
        "b0": jnp.zeros((1, EMBED), jnp.float32),
        "w1": glorot(ks[1], (EMBED, EMBED)),
        "b1": jnp.zeros((1, EMBED), jnp.float32),
        "w2": glorot(ks[2], (EMBED, EMBED)),
        "b2": jnp.zeros((1, EMBED), jnp.float32),
        "w_out": glorot(ks[3], (2 * EMBED, NUM_CLASSES)),
        "b_out": jnp.zeros((1, NUM_CLASSES), jnp.float32),
    }


if __name__ == "__main__":
    key = jax.random.PRNGKey(0)
    k_param, k_x = jax.random.split(key)

    NUM_BLOCKS = 8            # grid extent: super-blocks per kernel call
    GRAPHS_PER_BLOCK = 16     # molecules per super-block
    NODES_PER_GRAPH = 16      # per-graph padded node block (contiguous rows)
    assert NODES_PER_GRAPH % 8 == 0      # keep sublane-tile-aligned reshapes
    SB = GRAPHS_PER_BLOCK * NODES_PER_GRAPH   # 256 node rows per super-block
    N_TOTAL = NUM_BLOCKS * SB                 # 2048 node rows per call
    B_TOTAL = NUM_BLOCKS * GRAPHS_PER_BLOCK   # 128 molecules per call

    # Deterministic batch of small molecules: alternating chains and rings
    # with 5..12 atoms, each occupying a contiguous padded block of 16 rows.
    a_blocks = []
    valid_list = [0.0] * N_TOTAL
    mask_rows = [[0.0] * SB for _ in range(B_TOTAL)]
    counts_list = []
    for blk in range(NUM_BLOCKS):
        edges = []
        v_local = [0.0] * SB
        for g in range(GRAPHS_PER_BLOCK):
            gg = blk * GRAPHS_PER_BLOCK + g
            n_g = 5 + (gg % 8)
            base = g * NODES_PER_GRAPH           # local index within block
            counts_list.append(float(n_g))
            for i in range(n_g):
                v_local[base + i] = 1.0
                valid_list[blk * SB + base + i] = 1.0
                mask_rows[gg][base + i] = 1.0
            if gg % 2 == 0:   # chain
                for i in range(n_g - 1):
                    edges += [(base + i, base + i + 1), (base + i + 1, base + i)]
            else:             # ring
                for i in range(n_g):
                    u, v = base + i, base + (i + 1) % n_g
                    edges += [(u, v), (v, u)]
        ei = jnp.array(edges, dtype=jnp.int32).T               # (2, num_edges)
        a_blocks.append(
            build_norm_adj(ei, jnp.array(v_local, jnp.float32), SB))

    a_blk = jnp.concatenate(a_blocks, axis=0)                  # (NB*SB, SB)
    valid = jnp.array(valid_list, jnp.float32)                 # (N,)
    mask = jnp.array(mask_rows, jnp.float32)                   # (B_TOTAL, SB)
    counts = jnp.array(counts_list, jnp.float32)               # (B_TOTAL,)
    inv_counts = (1.0 / jnp.maximum(counts, 1.0))[:, None]     # (B_TOTAL, 1)
    pad_penalty = ((valid - 1.0) * 4.0)[:, None]               # (N, 1): 0 / -4

    # Node features: random on real nodes, zero on padded rows/features.
    x = jax.random.normal(k_x, (N_TOTAL, NUM_FEATURES), jnp.float32)
    x = x * valid[:, None]
    x_pad = jnp.pad(x, ((0, 0), (0, F_PAD - NUM_FEATURES)))    # (N, F_PAD)

    params = init_params(k_param)

    fwd = jax.jit(net_forward)
    out, hidden = fwd(params, a_blk, x_pad, pad_penalty, mask, inv_counts)
    jax.block_until_ready((out, hidden))

    assert out.shape == (B_TOTAL, NUM_CLASSES)
    assert hidden.shape == (B_TOTAL, 2 * EMBED)
    assert bool(jnp.all(jnp.isfinite(out))) and bool(jnp.all(jnp.isfinite(hidden)))
    print("KERNEL_OK")
</pallas_src>

<mosaic_0001>
module attributes {stable_mosaic.version = 11 : i64} {
  func.func @_fused_net_kernel(%arg0: i32, %arg1: memref<256x256xbf16, #tpu.memory_space<vmem>>, %arg2: memref<256x16xbf16, #tpu.memory_space<vmem>>, %arg3: memref<16x64xbf16, #tpu.memory_space<vmem>>, %arg4: memref<1x64xf32, #tpu.memory_space<vmem>>, %arg5: memref<64x64xbf16, #tpu.memory_space<vmem>>, %arg6: memref<1x64xf32, #tpu.memory_space<vmem>>, %arg7: memref<64x64xbf16, #tpu.memory_space<vmem>>, %arg8: memref<1x64xf32, #tpu.memory_space<vmem>>, %arg9: memref<256x1xf32, #tpu.memory_space<vmem>>, %arg10: memref<16x256xbf16, #tpu.memory_space<vmem>>, %arg11: memref<16x1xf32, #tpu.memory_space<vmem>>, %arg12: memref<1x128xf32, #tpu.memory_space<vmem>>, %arg13: memref<1x1xf32, #tpu.memory_space<vmem>>, %arg14: memref<16x1xf32, #tpu.memory_space<vmem>>, %arg15: memref<16x128xf32, #tpu.memory_space<vmem>>) attributes {dimension_semantics = [#tpu.dimension_semantics<parallel>], iteration_bounds = array<i64: 8>, scalar_prefetch = 0 : i64, scratch_operands = 0 : i64, tpu.core_type = #tpu.core_type<tc>, window_params = [{transform_indices = @transform_0, window_bounds = array<i64: 256, 256>}, {transform_indices = @transform_1, window_bounds = array<i64: 256, 16>}, {pipeline_mode = #tpu.pipeline_mode<synchronous>, transform_indices = @transform_2, window_bounds = array<i64: 16, 64>}, {pipeline_mode = #tpu.pipeline_mode<synchronous>, transform_indices = @transform_3, window_bounds = array<i64: 1, 64>}, {pipeline_mode = #tpu.pipeline_mode<synchronous>, transform_indices = @transform_4, window_bounds = array<i64: 64, 64>}, {pipeline_mode = #tpu.pipeline_mode<synchronous>, transform_indices = @transform_5, window_bounds = array<i64: 1, 64>}, {pipeline_mode = #tpu.pipeline_mode<synchronous>, transform_indices = @transform_6, window_bounds = array<i64: 64, 64>}, {pipeline_mode = #tpu.pipeline_mode<synchronous>, transform_indices = @transform_7, window_bounds = array<i64: 1, 64>}, {transform_indices = @transform_8, window_bounds = array<i64: 256, 1>}, {transform_indices = @transform_9, window_bounds = array<i64: 16, 256>}, {transform_indices = @transform_10, window_bounds = array<i64: 16, 1>}, {pipeline_mode = #tpu.pipeline_mode<synchronous>, transform_indices = @transform_11, window_bounds = array<i64: 1, 128>}, {pipeline_mode = #tpu.pipeline_mode<synchronous>, transform_indices = @transform_12, window_bounds = array<i64: 1, 1>}, {transform_indices = @transform_13, window_bounds = array<i64: 16, 1>}, {transform_indices = @transform_14, window_bounds = array<i64: 16, 128>}]} {
    %c0 = arith.constant 0 : index
    %c0_0 = arith.constant 0 : index
    %0 = vector.load %arg1[%c0, %c0_0] : memref<256x256xbf16, #tpu.memory_space<vmem>>, vector<256x256xbf16>
    %c0_1 = arith.constant 0 : index
    %c0_2 = arith.constant 0 : index
    %1 = vector.load %arg2[%c0_1, %c0_2] : memref<256x16xbf16, #tpu.memory_space<vmem>>, vector<256x16xbf16>
    %c0_3 = arith.constant 0 : index
    %c0_4 = arith.constant 0 : index
    %2 = vector.load %arg3[%c0_3, %c0_4] : memref<16x64xbf16, #tpu.memory_space<vmem>>, vector<16x64xbf16>
    %cst = arith.constant dense<0.000000e+00> : vector<256x64xf32>
    %3 = tpu.matmul %1, %2, %cst {dimension_numbers = #tpu.dot_dimension_numbers<[1], [0], [0], [1], [0, 0, 1, 1], [], []>} : vector<256x16xbf16>, vector<16x64xbf16>, vector<256x64xf32> -> vector<256x64xf32>
    %4 = arith.truncf %3 : vector<256x64xf32> to vector<256x64xbf16>
    %cst_5 = arith.constant dense<0.000000e+00> : vector<256x64xf32>
    %5 = tpu.matmul %0, %4, %cst_5 {dimension_numbers = #tpu.dot_dimension_numbers<[1], [0], [0], [1], [0, 0, 1, 1], [], []>} : vector<256x256xbf16>, vector<256x64xbf16>, vector<256x64xf32> -> vector<256x64xf32>
    %c0_6 = arith.constant 0 : index
    %c0_7 = arith.constant 0 : index
    %6 = vector.load %arg4[%c0_6, %c0_7] : memref<1x64xf32, #tpu.memory_space<vmem>>, vector<1x64xf32>
    %7 = vector.broadcast %6 : vector<1x64xf32> to vector<256x64xf32>
    %8 = arith.addf %5, %7 : vector<256x64xf32>
    %9 = math.tanh %8 : vector<256x64xf32>
    %10 = arith.truncf %9 : vector<256x64xf32> to vector<256x64xbf16>
    %c0_8 = arith.constant 0 : index
    %c0_9 = arith.constant 0 : index
    %11 = vector.load %arg5[%c0_8, %c0_9] : memref<64x64xbf16, #tpu.memory_space<vmem>>, vector<64x64xbf16>
    %cst_10 = arith.constant dense<0.000000e+00> : vector<256x64xf32>
    %12 = tpu.matmul %10, %11, %cst_10 {dimension_numbers = #tpu.dot_dimension_numbers<[1], [0], [0], [1], [0, 0, 1, 1], [], []>} : vector<256x64xbf16>, vector<64x64xbf16>, vector<256x64xf32> -> vector<256x64xf32>
    %13 = arith.truncf %12 : vector<256x64xf32> to vector<256x64xbf16>
    %cst_11 = arith.constant dense<0.000000e+00> : vector<256x64xf32>
    %14 = tpu.matmul %0, %13, %cst_11 {dimension_numbers = #tpu.dot_dimension_numbers<[1], [0], [0], [1], [0, 0, 1, 1], [], []>} : vector<256x256xbf16>, vector<256x64xbf16>, vector<256x64xf32> -> vector<256x64xf32>
    %c0_12 = arith.constant 0 : index
    %c0_13 = arith.constant 0 : index
    %15 = vector.load %arg6[%c0_12, %c0_13] : memref<1x64xf32, #tpu.memory_space<vmem>>, vector<1x64xf32>
    %16 = vector.broadcast %15 : vector<1x64xf32> to vector<256x64xf32>
    %17 = arith.addf %14, %16 : vector<256x64xf32>
    %18 = math.tanh %17 : vector<256x64xf32>
    %19 = arith.truncf %18 : vector<256x64xf32> to vector<256x64xbf16>
    %c0_14 = arith.constant 0 : index
    %c0_15 = arith.constant 0 : index
    %20 = vector.load %arg7[%c0_14, %c0_15] : memref<64x64xbf16, #tpu.memory_space<vmem>>, vector<64x64xbf16>
    %cst_16 = arith.constant dense<0.000000e+00> : vector<256x64xf32>
    %21 = tpu.matmul %19, %20, %cst_16 {dimension_numbers = #tpu.dot_dimension_numbers<[1], [0], [0], [1], [0, 0, 1, 1], [], []>} : vector<256x64xbf16>, vector<64x64xbf16>, vector<256x64xf32> -> vector<256x64xf32>
    %22 = arith.truncf %21 : vector<256x64xf32> to vector<256x64xbf16>
    %cst_17 = arith.constant dense<0.000000e+00> : vector<256x64xf32>
    %23 = tpu.matmul %0, %22, %cst_17 {dimension_numbers = #tpu.dot_dimension_numbers<[1], [0], [0], [1], [0, 0, 1, 1], [], []>} : vector<256x256xbf16>, vector<256x64xbf16>, vector<256x64xf32> -> vector<256x64xf32>
    %c0_18 = arith.constant 0 : index
    %c0_19 = arith.constant 0 : index
    %24 = vector.load %arg8[%c0_18, %c0_19] : memref<1x64xf32, #tpu.memory_space<vmem>>, vector<1x64xf32>
    %25 = vector.broadcast %24 : vector<1x64xf32> to vector<256x64xf32>
    %26 = arith.addf %23, %25 : vector<256x64xf32>
    %27 = math.tanh %26 : vector<256x64xf32>
    %c0_20 = arith.constant 0 : index
    %c0_21 = arith.constant 0 : index
    %28 = vector.load %arg10[%c0_20, %c0_21] : memref<16x256xbf16, #tpu.memory_space<vmem>>, vector<16x256xbf16>
    %29 = arith.truncf %27 : vector<256x64xf32> to vector<256x64xbf16>
    %cst_22 = arith.constant dense<0.000000e+00> : vector<16x64xf32>
    %30 = tpu.matmul %28, %29, %cst_22 {dimension_numbers = #tpu.dot_dimension_numbers<[1], [0], [0], [1], [0, 0, 1, 1], [], []>} : vector<16x256xbf16>, vector<256x64xbf16>, vector<16x64xf32> -> vector<16x64xf32>
    %c0_23 = arith.constant 0 : index
    %c0_24 = arith.constant 0 : index
    %31 = vector.load %arg11[%c0_23, %c0_24] : memref<16x1xf32, #tpu.memory_space<vmem>>, vector<16x1xf32>
    %32 = vector.broadcast %31 : vector<16x1xf32> to vector<16x64xf32>
    %33 = arith.mulf %30, %32 : vector<16x64xf32>
    %c0_25 = arith.constant 0 : index
    %c0_26 = arith.constant 0 : index
    %34 = vector.load %arg9[%c0_25, %c0_26] : memref<256x1xf32, #tpu.memory_space<vmem>>, vector<256x1xf32>
    %35 = vector.broadcast %34 : vector<256x1xf32> to vector<256x64xf32>
    %36 = arith.addf %27, %35 : vector<256x64xf32>
    %37 = vector.shape_cast %36 : vector<256x64xf32> to vector<16x16x64xf32>
    %cst_27 = arith.constant dense<0xFF800000> : vector<16x64xf32>
    %38 = vector.multi_reduction <maximumf>, %37, %cst_27 [1] : vector<16x16x64xf32> to vector<16x64xf32>
    %39 = tpu.concatenate %38, %33 in 1 : vector<16x64xf32>, vector<16x64xf32> -> vector<16x128xf32>
    %c0_28 = arith.constant 0 : index
    %c0_29 = arith.constant 0 : index
    %40 = vector.load %arg15[%c0_28, %c0_29] : memref<16x128xf32, #tpu.memory_space<vmem>>, vector<16x128xf32>
    tpu.vector_store %arg15[%c0_28, %c0_29], %39 {strides = array<i32>} : memref<16x128xf32, #tpu.memory_space<vmem>>, vector<16x128xf32>,
    %c0_30 = arith.constant 0 : index
    %c0_31 = arith.constant 0 : index
    %41 = vector.load %arg12[%c0_30, %c0_31] : memref<1x128xf32, #tpu.memory_space<vmem>>, vector<1x128xf32>
    %42 = vector.broadcast %41 : vector<1x128xf32> to vector<16x128xf32>
    %43 = arith.mulf %39, %42 : vector<16x128xf32>
    %cst_32 = arith.constant dense<0.000000e+00> : vector<16xf32>
    %44 = vector.multi_reduction <add>, %43, %cst_32 [1] : vector<16x128xf32> to vector<16xf32>
    %45 = vector.shape_cast %44 : vector<16xf32> to vector<16x1xf32>
    %c0_33 = arith.constant 0 : index
    %c0_34 = arith.constant 0 : index
    %46 = vector.load %arg13[%c0_33, %c0_34] : memref<1x1xf32, #tpu.memory_space<vmem>>, vector<1x1xf32>
    %47 = vector.broadcast %46 : vector<1x1xf32> to vector<16x1xf32>
    %48 = arith.addf %45, %47 : vector<16x1xf32>
    %c0_35 = arith.constant 0 : index
    %c0_36 = arith.constant 0 : index
    %49 = vector.load %arg14[%c0_35, %c0_36] : memref<16x1xf32, #tpu.memory_space<vmem>>, vector<16x1xf32>
    tpu.vector_store %arg14[%c0_35, %c0_36], %48 {strides = array<i32>} : memref<16x1xf32, #tpu.memory_space<vmem>>, vector<16x1xf32>,
    return
  }
  func.func @transform_0(%arg0: i32) -> (i32, i32) {
    %c0_i32 = arith.constant 0 : i32
    %c0_i32_0 = arith.constant 0 : i32
    return %arg0, %c0_i32 : i32, i32
  }
  func.func @transform_1(%arg0: i32) -> (i32, i32) {
    %c0_i32 = arith.constant 0 : i32
    %c0_i32_0 = arith.constant 0 : i32
    return %arg0, %c0_i32 : i32, i32
  }
  func.func @transform_2(%arg0: i32) -> (i32, i32) {
    %c0_i32 = arith.constant 0 : i32
    %c0_i32_0 = arith.constant 0 : i32
    %c0_i32_1 = arith.constant 0 : i32
    return %c0_i32, %c0_i32_0 : i32, i32
  }
  func.func @transform_3(%arg0: i32) -> (i32, i32) {
    %c0_i32 = arith.constant 0 : i32
    %c0_i32_0 = arith.constant 0 : i32
    %c0_i32_1 = arith.constant 0 : i32
    return %c0_i32, %c0_i32_0 : i32, i32
  }
  func.func @transform_4(%arg0: i32) -> (i32, i32) {
    %c0_i32 = arith.constant 0 : i32
    %c0_i32_0 = arith.constant 0 : i32
    %c0_i32_1 = arith.constant 0 : i32
    return %c0_i32, %c0_i32_0 : i32, i32
  }
  func.func @transform_5(%arg0: i32) -> (i32, i32) {
    %c0_i32 = arith.constant 0 : i32
    %c0_i32_0 = arith.constant 0 : i32
    %c0_i32_1 = arith.constant 0 : i32
    return %c0_i32, %c0_i32_0 : i32, i32
  }
  func.func @transform_6(%arg0: i32) -> (i32, i32) {
    %c0_i32 = arith.constant 0 : i32
    %c0_i32_0 = arith.constant 0 : i32
    %c0_i32_1 = arith.constant 0 : i32
    return %c0_i32, %c0_i32_0 : i32, i32
  }
  func.func @transform_7(%arg0: i32) -> (i32, i32) {
    %c0_i32 = arith.constant 0 : i32
    %c0_i32_0 = arith.constant 0 : i32
    %c0_i32_1 = arith.constant 0 : i32
    return %c0_i32, %c0_i32_0 : i32, i32
  }
  func.func @transform_8(%arg0: i32) -> (i32, i32) {
    %c0_i32 = arith.constant 0 : i32
    %c0_i32_0 = arith.constant 0 : i32
    return %arg0, %c0_i32 : i32, i32
  }
  func.func @transform_9(%arg0: i32) -> (i32, i32) {
    %c0_i32 = arith.constant 0 : i32
    %c0_i32_0 = arith.constant 0 : i32
    return %arg0, %c0_i32 : i32, i32
  }
  func.func @transform_10(%arg0: i32) -> (i32, i32) {
    %c0_i32 = arith.constant 0 : i32
    %c0_i32_0 = arith.constant 0 : i32
    return %arg0, %c0_i32 : i32, i32
  }
  func.func @transform_11(%arg0: i32) -> (i32, i32) {
    %c0_i32 = arith.constant 0 : i32
    %c0_i32_0 = arith.constant 0 : i32
    %c0_i32_1 = arith.constant 0 : i32
    return %c0_i32, %c0_i32_0 : i32, i32
  }
  func.func @transform_12(%arg0: i32) -> (i32, i32) {
    %c0_i32 = arith.constant 0 : i32
    %c0_i32_0 = arith.constant 0 : i32
    %c0_i32_1 = arith.constant 0 : i32
    return %c0_i32, %c0_i32_0 : i32, i32
  }
  func.func @transform_13(%arg0: i32) -> (i32, i32) {
    %c0_i32 = arith.constant 0 : i32
    %c0_i32_0 = arith.constant 0 : i32
    return %arg0, %c0_i32 : i32, i32
  }
  func.func @transform_14(%arg0: i32) -> (i32, i32) {
    %c0_i32 = arith.constant 0 : i32
    %c0_i32_0 = arith.constant 0 : i32
    return %arg0, %c0_i32 : i32, i32
  }
}

</mosaic_0001>

<bundles_post_ra>
// kernel: net_forward.1
= control target key start
LH: loop header
LB: loop body
LE: loop exit
PB: predicated region body
PF: predicated region fallthrough
CT: control target
= control target key end

     0   :  { %s4389_s0 = inlined_call_operand.vmem [shape: bf16[2048,256], index: 0, kind: input, shape index: {}]   ;;  %s4390_s1 = inlined_call_operand.vmem [shape: bf16[2048,16], index: 1, kind: input, shape index: {}]   ;;  %s4391_s2 = inlined_call_operand.vmem [shape: bf16[16,64], index: 2, kind: input, shape index: {}]   ;;  %s4392_s3 = inlined_call_operand.vmem [shape: f32[1,64], index: 3, kind: input, shape index: {}]   ;;  %s4393_s4 = inlined_call_operand.vmem [shape: bf16[64,64], index: 4, kind: input, shape index: {}]   ;;  %s4394_s5 = inlined_call_operand.vmem [shape: f32[1,64], index: 5, kind: input, shape index: {}]   ;;  %s4395_s6 = inlined_call_operand.vmem [shape: bf16[64,64], index: 6, kind: input, shape index: {}]   ;;  %s4396_s7 = inlined_call_operand.vmem [shape: f32[1,64], index: 7, kind: input, shape index: {}]   ;;  %s4397_s8 = inlined_call_operand.vmem [shape: f32[2048,1], index: 8, kind: input, shape index: {}]   ;;  %s4398_s9 = inlined_call_operand.vmem [shape: bf16[128,256], index: 9, kind: input, shape index: {}]   ;;  %s4399_s10 = inlined_call_operand.vmem [shape: f32[128,1], index: 10, kind: input, shape index: {}]   ;;  %s4400_s11 = inlined_call_operand.vmem [shape: f32[1,128], index: 11, kind: input, shape index: {}]   ;;  %s4401_s12 = inlined_call_operand.<no memory space> [shape: f32[1,1], index: 12, kind: input, shape index: {}]   ;;  %s4402_s13 = inlined_call_operand.vmem [shape: f32[128,1], index: 13, kind: output, shape index: {0}]   ;;  %s4403_s14 = inlined_call_operand.hbm [shape: f32[128,128], index: 14, kind: output, shape index: {1}]  }
   0x1   :  { %4405 = sst [smem:[#allocation6_spill]] %s4389_s0  ;;  %v20_v0 = vstv %s4401_s12 }
   0x2   :  { %4406 = sst [smem:[#allocation7_spill]] %s4390_s1  ;;  %21 = vst [vmem:[#allocation2] sm:$0x1] %v20_v0 }
   0x3   :  { %4407 = sst [smem:[#allocation8_spill]] %s4391_s2 }
   0x4   :  { %4408 = sst [smem:[#allocation9_spill]] %s4392_s3 }
   0x5   :  { %4409 = sst [smem:[#allocation10_spill]] %s4393_s4 }
   0x6   :  { %4410 = sst [smem:[#allocation11_spill]] %s4394_s5 }
   0x7   :  { %22 = vsyncpa [#allocation4], 0 }
   0x8   :  { %24 = vsyncpa [#allocation4 + $0x1], 0  ;;  %s3521_s15 = smov 0   ;;  %s3523_s16 = smov 0  }
   0x9   :  { %s3525_s17 = smov 0   ;;  %s3527_s18 = smov 0  }
   0xa LB: > { %s3542_s12 = sadd.s32 4294967295, %s3437_s18   ;;  %s2759_s19 = sadd.s32 4294967294, %s3437_s18   ;;  %s3437_s18 = sphi %s3527_s18, %s4426_s18   ;;  %s3433_s17 = sphi %s3525_s17, %s4425_s17   ;;  %s3429_s16 = sphi %s3523_s16, %s4424_s16   ;;  %s3425_s15 = sphi %s3521_s15, %s4423_s15  }
   0xb   : > { %s3546_s20 = sadd.s32 1, %s3437_s18   ;;  %s361_s21 = sadd.s32 1, %s3433_s17 }
   0xc   : > { %s358_s22 = ssub.s32 %s3437_s18, %s3546_s20  ;;  %p371_p0 = scmp.ne.s32.totalorder %s3433_s17, %s3429_s16 }
   0xd   : > { %p359_p1 = scmp.eq.s32.totalorder %s358_s22, 0  ;;  %p372_p2 = scmp.eq.s32.totalorder %s3542_s12, 7 }
   0xe   : > { %p377_p3 = scmp.ne.s32.totalorder %s3429_s16, %s3425_s15  ;;  %p378_p4 = scmp.eq.s32.totalorder %s2759_s19, 7 }
   0xf   : > { %s3557_s23 = scalar_select %p359_p1, %s3433_s17, %s361_s21  }
  0x10   : > { %p3559_p5 = por %p372_p2, %p371_p0  ;;  %p3563_p6 = por %p378_p4, %p377_p3 }
  0x11   : > { %p2762_p7 = scmp.ge.s32.totalorder %s3437_s18, 1  ;;  %p467_p8 = scmp.lt.s32.totalorder %s3437_s18, 9 }
  0x13   : > { %p468_p9 = pnand %p2762_p7, %p467_p8 }
  0x14   : > { %s4413_s2 = sld [smem:[#allocation8_spill]] (!%p468_p9)  ;;  %s2764_s28 = sshll.u32 (!%p468_p9), %s3542_s12, 5 }
  0x15   : > { %471 = sbr.rel (%p468_p9) target bundleno = 2173 (0x87d), region = 72  ;;  %p541_p10 = scmp.lt.s32.totalorder (!%p468_p9), %s2764_s28, 255 }
  0x16   : > { %s4414_s1 = sld [smem:[#allocation7_spill]] (!%p468_p9)  ;;  %s3440_s27 = smov (!%p468_p9), 64  }
  0x17   : > { %s4415_s0 = sld [smem:[#allocation6_spill]] (!%p468_p9) }
  0x18   : > { %s4416_s4 = sld [smem:[#allocation10_spill]] (!%p468_p9) }
  0x19   : > { %s4417_s3 = sld [smem:[#allocation9_spill]] (!%p468_p9) }
  0x1a   : > { %v3117_v1 = vld [vmem:[%s4413_s2] sm:$0xff]  ;;  %s4428_s28 = smov (!%p541_p10, %s2764_s28), 255  ;;  %vm732_vm0 = vcmask 130048   ;;  %vm1308_vm1 = vcmask 523264   ;;  %s4418_s5 = sld [smem:[#allocation11_spill]]  ;;  %vm2545_vm2 = vcmask 1041409  }
  0x1b   : > { %3129 = vmatpush.bf16.msra.mxu1 %v3117_v1  ;;  %3130 = vmatpush.bf16.msra.mxu2 %v3117_v1  ;;  %s2768_s29 = sshll.u32 %s4428_s28, 2  ;;  %s4404_s22 = sshll.u32 %s4428_s28, 3  ;;  %vm2547_vm3 = vcmask 1042434   ;;  %vm2549_vm4 = vcmask 1043459   ;;  %vm2551_vm5 = vcmask 1044484   ;;  %vm2553_vm6 = vcmask 1045509  }
  0x1c   : > { %3131 = vmatpush.bf16.msra.mxu3 %v3117_v1  ;;  %788 = vmatpush.bf16.msra.mxu0 %v3117_v1  ;;  %s3579_s21 = scalar_lea.vmem %s4414_s1, %s2768_s29  ;;  %s4422_s30 = sshll.u32 %s4428_s28, 3  ;;  %vm2555_vm7 = vcmask 1046534   ;;  %vm2557_vm8 = vcmask 1047559  }
  0x1d   : > { %v3103_v2 = vld [vmem:[%s3579_s21 + $0x10] sm:$0xff]  ;;  %v3112_v4 = vld [vmem:[%s3579_s21 + $0x58] sm:$0xff]  ;;  %v3113_v7 = vld [vmem:[%s3579_s21 + $0x60] sm:$0xff]  ;;  %s3621_s29 = scalar_lea.vmem %s4415_s0, %s4404_s22  ;;  %s4027_s22 = scalar_lea.vmem %s4397_s8, %s4422_s30 }
  0x1e   : > { %v3107_v3 = vld [vmem:[%s3579_s21 + $0x30] sm:$0xff]  ;;  %2848 = vmatmul.msk.bf16.vlgmr.msra.gmra.mxu1 %vm732_vm0, %v3103_v2  ;;  %v3104_v5 = vld [vmem:[%s3579_s21 + $0x18] sm:$0xff]  ;;  %v3101_v8 = vld [vmem:[%s3579_s21] sm:$0xff] }
  0x1f   : > { %2852 = vmatmul.msk.bf16.vlgmr.msra.gmra.mxu2 %vm732_vm0, %v3107_v3  ;;  %2857 = vmatmul.msk.bf16.vlgmr.msra.gmra.mxu3 %vm732_vm0, %v3112_v4  ;;  %v3108_v6 = vld [vmem:[%s3579_s21 + $0x38] sm:$0xff]  ;;  %v3105_v9 = vld [vmem:[%s3579_s21 + $0x20] sm:$0xff]  ;;  %v3114_v11 = vld [vmem:[%s3579_s21 + $0x68] sm:$0xff] }
  0x20   : > { %2846 = vmatmul.msk.bf16.vlgmr.msra.gmra.mxu0 %vm732_vm0, %v3101_v8  ;;  %v3109_v10 = vld [vmem:[%s3579_s21 + $0x40] sm:$0xff]  ;;  %v3102_v12 = vld [vmem:[%s3579_s21 + $0x8] sm:$0xff]  ;;  %v3115_v15 = vld [vmem:[%s3579_s21 + $0x70] sm:$0xff] }
  0x21   : > { %v3106_v13 = vld [vmem:[%s3579_s21 + $0x28] sm:$0xff]  ;;  %v3111_v16 = vld [vmem:[%s3579_s21 + $0x50] sm:$0xff]  ;;  %v3116_v17 = vld [vmem:[%s3579_s21 + $0x78] sm:$0xff] }
  0x22   : > { %v3110_v14 = vld [vmem:[%s3579_s21 + $0x48] sm:$0xff]  ;;  %v2864_v54 = vld [vmem:[%s3621_s29] sm:$0xf]  ;;  %v2872_v63 = vld [vmem:[%s3621_s29 + $0x10] sm:$0xf] }
  0x23   : > { %v3070_v55 = vld [vmem:[%s3621_s29 + $0x4] sm:$0xf0]  ;;  %v3072_v0 = vld [vmem:[%s3621_s29 + $0x14] sm:$0xf0]  ;;  %v2866_v8 = vld [vmem:[%s3621_s29 + $0x8] sm:$0xf0] }
  0x24   : > { %v3625_v57 = vor.u32 %v3070_v55, %v2864_v54  ;;  %v3630_v2 = vor.u32 %v3072_v0, %v2872_v63  ;;  %v2922_v54 = vld [vmem:[%s3621_s29 + $0x78] sm:$0xf0]  ;;  %v2936_v55 = vld [vmem:[%s3621_s29 + $0x90] sm:$0xf]  ;;  %v3118_v63 = vld [vmem:[%s4416_s4] sm:$0xff] }
  0x2e   : > { %2849 = vmatmul.msk.bf16.gmra.mxu1 %vm732_vm0, %v3104_v5 }
  0x2f   : > { %2853 = vmatmul.msk.bf16.gmra.mxu2 %vm732_vm0, %v3108_v6  ;;  %2858 = vmatmul.msk.bf16.gmra.mxu3 %vm732_vm0, %v3113_v7  ;;  %v3069_v7 = vld [vmem:[%s3621_s29 + $0x4] sm:$0xf] }
  0x30   : > { %2847 = vmatmul.msk.bf16.gmra.mxu0 %vm732_vm0, %v3102_v12  ;;  %v3638_v12 = vor.u32 %v3069_v7, %v2866_v8 }
  0x3e   : > { %2850 = vmatmul.msk.bf16.gmra.mxu1 %vm732_vm0, %v3105_v9  ;;  %v2880_v9 = vld [vmem:[%s3621_s29 + $0x20] sm:$0xf] }
  0x3f   : > { %2854 = vmatmul.msk.bf16.gmra.mxu2 %vm732_vm0, %v3109_v10  ;;  %2859 = vmatmul.msk.bf16.gmra.mxu3 %vm732_vm0, %v3114_v11  ;;  %v3074_v10 = vld [vmem:[%s3621_s29 + $0x24] sm:$0xf0] }
  0x4e   : > { %2851 = vmatmul.msk.bf16.gmra.mxu1 %vm732_vm0, %v3106_v13  ;;  %v3640_v13 = vor.u32 %v3074_v10, %v2880_v9  ;;  %v3738_v9 = vld [vmem:[%s4417_s3] ss:$0 sm:$0xff] }
  0x4f   : > { %2855 = vmatmul.msk.bf16.gmra.mxu2 %vm732_vm0, %v3110_v14  ;;  %2860 = vmatmul.msk.bf16.gmra.mxu3 %vm732_vm0, %v3115_v15  ;;  %v3071_v14 = vld [vmem:[%s3621_s29 + $0x14] sm:$0xf]  ;;  %v2874_v15 = vld [vmem:[%s3621_s29 + $0x18] sm:$0xf0] }
  0x5f   : > { %2856 = vmatmul.msk.bf16.gmra.mxu2 %vm732_vm0, %v3111_v16  ;;  %2861 = vmatmul.msk.bf16.gmra.mxu3 %vm732_vm0, %v3116_v17  ;;  %v2888_v16 = vld [vmem:[%s3621_s29 + $0x30] sm:$0xf]  ;;  %v3076_v17 = vld [vmem:[%s3621_s29 + $0x34] sm:$0xf0] }
  0x9b   : > { %v800_v18 = vpop.f32.mrf.mxu1 }
  0x9d   : > { %v790_v33 = vpop.f32.mrf.mxu0 }
  0xa2   : > { %v820_v19 = vpop.f32.mrf.mxu2  ;;  %v3613_v20 = vpop.f32.mrf.mxu3 }
  0xa3   : > { %v802_v21 = vpop.f32.mrf.mxu1 }
  0xa4   : > { %v872_v50 = vpack.c.bf16 %v802_v21, %v800_v18  ;;  %v3648_v18 = vor.u32 %v3071_v14, %v2874_v15  ;;  %v2882_v21 = vld [vmem:[%s3621_s29 + $0x28] sm:$0xf0] }
  0xa5   : > { %v792_v39 = vpop.f32.mrf.mxu0 }
  0xa6   : > { %v870_v53 = vpack.c.bf16 %v792_v39, %v790_v33  ;;  %v2898_v33 = vld [vmem:[%s3621_s29 + $0x48] sm:$0xf0]  ;;  %v2906_v39 = vld [vmem:[%s3621_s29 + $0x58] sm:$0xf0] }
  0xaa   : > { %v822_v22 = vpop.f32.mrf.mxu2  ;;  %v847_v23 = vpop.f32.mrf.mxu3 }
  0xab   : > { %v805_v24 = vpop.f32.mrf.mxu1  ;;  %v876_v32 = vpack.c.bf16 %v822_v22, %v820_v19  ;;  %v881_v3 = vpack.c.bf16 %v847_v23, %v3613_v20  ;;  %v3650_v19 = vor.u32 %v3076_v17, %v2888_v16  ;;  %v3073_v20 = vld [vmem:[%s3621_s29 + $0x24] sm:$0xf]  ;;  %v2896_v22 = vld [vmem:[%s3621_s29 + $0x40] sm:$0xf]  ;;  %v3078_v23 = vld [vmem:[%s3621_s29 + $0x44] sm:$0xf0] }
  0xac   : > { %v3087_v16 = vld [vmem:[%s3621_s29 + $0x94] sm:$0xf]  ;;  %v2938_v17 = vld [vmem:[%s3621_s29 + $0x98] sm:$0xf0] }
  0xad   : > { %v795_v44 = vpop.f32.mrf.mxu0 }
  0xb2   : > { %v825_v25 = vpop.f32.mrf.mxu2  ;;  %v850_v26 = vpop.f32.mrf.mxu3 }
  0xb3   : > { %v807_v27 = vpop.f32.mrf.mxu1 }
  0xb4   : > { %v873_v47 = vpack.c.bf16 %v807_v27, %v805_v24  ;;  %v3658_v24 = vor.u32 %v3073_v20, %v2882_v21  ;;  %v2890_v27 = vld [vmem:[%s3621_s29 + $0x38] sm:$0xf0]  ;;  %v2952_v21 = vld [vmem:[%s3621_s29 + $0xb0] sm:$0xf] }
  0xb5   : > { %v797_v49 = vpop.f32.mrf.mxu0 }
  0xb6   : > { %v871_v52 = vpack.c.bf16 %v797_v49, %v795_v44  ;;  %v3081_v44 = vld [vmem:[%s3621_s29 + $0x64] sm:$0xf] }
  0xba   : > { %v827_v28 = vpop.f32.mrf.mxu2  ;;  %v852_v29 = vpop.f32.mrf.mxu3 }
  0xbb   : > { %v877_v30 = vpack.c.bf16 %v827_v28, %v825_v25  ;;  %v810_v31 = vpop.f32.mrf.mxu1  ;;  %v882_v1 = vpack.c.bf16 %v852_v29, %v850_v26  ;;  %v3660_v25 = vor.u32 %v3078_v23, %v2896_v22  ;;  %v3075_v26 = vld [vmem:[%s3621_s29 + $0x34] sm:$0xf]  ;;  %v2904_v28 = vld [vmem:[%s3621_s29 + $0x50] sm:$0xf]  ;;  %v3080_v29 = vld [vmem:[%s3621_s29 + $0x54] sm:$0xf0] }
  0xbc   : > { %v3092_v22 = vld [vmem:[%s3621_s29 + $0xb4] sm:$0xf0] }
  0xbd   : > { %1050 = vmatpush.bf16.msrb.mxu1 %v877_v30  ;;  %v3668_v30 = vor.u32 %v3075_v26, %v2890_v27  ;;  %v3747_v27 = vor.u32 %v3087_v16, %v2938_v17 }
  0xc1   : > { %1051 = vmatpush.bf16.msrb.mxu1 %v876_v32  ;;  %v3077_v32 = vld [vmem:[%s3621_s29 + $0x44] sm:$0xf] }
  0xc2   : > { %v855_v34 = vpop.f32.mrf.mxu3  ;;  %v830_v37 = vpop.f32.mrf.mxu2 }
  0xc3   : > { %v812_v35 = vpop.f32.mrf.mxu1 }
  0xc4   : > { %v874_v45 = vpack.c.bf16 %v812_v35, %v810_v31  ;;  %v3670_v31 = vor.u32 %v3080_v29, %v2904_v28  ;;  %v3082_v35 = vld [vmem:[%s3621_s29 + $0x64] sm:$0xf0]  ;;  %v3749_v28 = vor.u32 %v3092_v22, %v2952_v21 }
  0xca   : > { %v857_v36 = vpop.f32.mrf.mxu3  ;;  %v832_v42 = vpop.f32.mrf.mxu2 }
  0xcb   : > { %v815_v38 = vpop.f32.mrf.mxu1  ;;  %v883_v62 = vpack.c.bf16 %v857_v36, %v855_v34  ;;  %v878_v11 = vpack.c.bf16 %v832_v42, %v830_v37  ;;  %v2912_v34 = vld [vmem:[%s3621_s29 + $0x60] sm:$0xf]  ;;  %v3678_v36 = vor.u32 %v3077_v32, %v2898_v33 }
  0xcc   : > { %v3680_v37 = vor.u32 %v3082_v35, %v2912_v34 }
  0xd2   : > { %v860_v40 = vpop.f32.mrf.mxu3  ;;  %v835_v48 = vpop.f32.mrf.mxu2 }
  0xd3   : > { %v817_v41 = vpop.f32.mrf.mxu1 }
  0xd4   : > { %v875_v43 = vpack.c.bf16 %v817_v41, %v815_v38  ;;  %v3079_v38 = vld [vmem:[%s3621_s29 + $0x54] sm:$0xf]  ;;  %v3084_v41 = vld [vmem:[%s3621_s29 + $0x74] sm:$0xf0] }
  0xd5   : > { %v3688_v42 = vor.u32 %v3079_v38, %v2906_v39 }
  0xd6   : > { %1052 = vmatpush.bf16.msrb.mxu1 %v875_v43 }
  0xda   : > { %v862_v46 = vpop.f32.mrf.mxu3  ;;  %1053 = vmatpush.bf16.msrb.mxu1 %v874_v45  ;;  %v837_v56 = vpop.f32.mrf.mxu2  ;;  %v2914_v45 = vld [vmem:[%s3621_s29 + $0x68] sm:$0xf0] }
  0xdb   : > { %v884_v60 = vpack.c.bf16 %v862_v46, %v860_v40  ;;  %v879_v6 = vpack.c.bf16 %v837_v56, %v835_v48  ;;  %v2920_v40 = vld [vmem:[%s3621_s29 + $0x70] sm:$0xf]  ;;  %v2928_v46 = vld [vmem:[%s3621_s29 + $0x80] sm:$0xf]  ;;  %v3698_v48 = vor.u32 %v3081_v44, %v2914_v45  ;;  %v3088_v56 = vld [vmem:[%s3621_s29 + $0x94] sm:$0xf0] }
  0xdc   : > { %v3690_v43 = vor.u32 %v3084_v41, %v2920_v40  ;;  %v3089_v41 = vld [vmem:[%s3621_s29 + $0xa4] sm:$0xf]  ;;  %v2946_v44 = vld [vmem:[%s3621_s29 + $0xa8] sm:$0xf0] }
  0xde   : > { %1054 = vmatpush.bf16.msrb.mxu1 %v873_v47  ;;  %v3086_v47 = vld [vmem:[%s3621_s29 + $0x84] sm:$0xf0] }
  0xdf   : > { %v3700_v49 = vor.u32 %v3086_v47, %v2928_v46  ;;  %v2960_v46 = vld [vmem:[%s3621_s29 + $0xc0] sm:$0xf]  ;;  %v3094_v47 = vld [vmem:[%s3621_s29 + $0xc4] sm:$0xf0] }
  0xe2   : > { %v865_v51 = vpop.f32.mrf.mxu3  ;;  %1055 = vmatpush.bf16.msrb.mxu1 %v872_v50  ;;  %v840_v61 = vpop.f32.mrf.mxu2 }
  0xe6   : > { %1056 = vmatpush.bf16.msrb.mxu1 %v871_v52  ;;  %v3121_v52 = vld [vmem:[%s4416_s4 + $0x18] sm:$0xff] }
  0xe7   : > { %1361 = vmatpush.bf16.msrb.mxu3 %v3121_v52  ;;  %v3760_v52 = vor.u32 %v3089_v41, %v2946_v44 }
  0xea   : > { %v867_v58 = vpop.f32.mrf.mxu3  ;;  %1057 = vmatpush.bf16.msrb.mxu1 %v870_v53  ;;  %v842_v4 = vpop.f32.mrf.mxu2  ;;  %v3083_v53 = vld [vmem:[%s3621_s29 + $0x74] sm:$0xf] }
  0xeb   : > { %v885_v59 = vpack.c.bf16 %v867_v58, %v865_v51  ;;  %v880_v5 = vpack.c.bf16 %v842_v4, %v840_v61  ;;  %v3120_v58 = vld [vmem:[%s4416_s4 + $0x10] sm:$0xff]  ;;  %v2944_v4 = vld [vmem:[%s3621_s29 + $0xa0] sm:$0xf] }
  0xec   : > { %1362 = vmatpush.bf16.msrb.mxu3 %v3120_v58 }
  0xed   : > { %1139 = vmatpush.bf16.msrb.mxu2 %v885_v59  ;;  %1058 = vmatmul.bf16.vlgmr.msrb.gmra.mxu1 %v3625_v57  ;;  %v3714_v59 = vor.u32 %v3083_v53, %v2922_v54  ;;  %v3762_v53 = vor.u32 %v3094_v47, %v2960_v46 }
  0xf1   : > { %1140 = vmatpush.bf16.msrb.mxu2 %v884_v60  ;;  %v3716_v60 = vor.u32 %v3088_v56, %v2936_v55 }
  0xf5   : > { %1141 = vmatpush.bf16.msrb.mxu2 %v883_v62  ;;  %v3119_v62 = vld [vmem:[%s4416_s4 + $0x8] sm:$0xff] }
  0xf6   : > { %1363 = vmatpush.bf16.msrb.mxu3 %v3119_v62 }
  0xf9   : > { %1142 = vmatpush.bf16.msrb.mxu2 %v882_v1  ;;  %v3085_v1 = vld [vmem:[%s3621_s29 + $0x84] sm:$0xf] }
  0xfa   : > { %1364 = vmatpush.bf16.msrb.mxu3 %v3118_v63 }
  0xfd   : > { %1143 = vmatpush.bf16.msrb.mxu2 %v881_v3  ;;  %1063 = vmatmul.bf16.gmra.mxu1 %v3630_v2  ;;  %v2930_v3 = vld [vmem:[%s3621_s29 + $0x88] sm:$0xf0] }
 0x101   : > { %1144 = vmatpush.bf16.msrb.mxu2 %v880_v5  ;;  %v3090_v5 = vld [vmem:[%s3621_s29 + $0xa4] sm:$0xf0] }
 0x102   : > { %v3732_v7 = vor.u32 %v3090_v5, %v2944_v4  ;;  %v2968_v5 = vld [vmem:[%s3621_s29 + $0xd0] sm:$0xf] }
 0x105   : > { %1145 = vmatpush.bf16.msrb.mxu2 %v879_v6  ;;  %v3730_v6 = vor.u32 %v3085_v1, %v2930_v3  ;;  %v3091_v1 = vld [vmem:[%s3621_s29 + $0xb4] sm:$0xf]  ;;  %v2954_v3 = vld [vmem:[%s3621_s29 + $0xb8] sm:$0xf0] }
 0x106   : > { %v3773_v16 = vor.u32 %v3091_v1, %v2954_v3  ;;  %v2984_v1 = vld [vmem:[%s3621_s29 + $0xf0] sm:$0xf]  ;;  %v3100_v3 = vld [vmem:[%s3621_s29 + $0xf4] sm:$0xf0] }
 0x109   : > { %1146 = vmatpush.bf16.msrb.mxu2 %v878_v11 }
 0x10c   : > { %1147 = vmatmul.bf16.vlgmr.msrb.gmra.mxu2 %v3638_v12 }
 0x10d   : > { %1068 = vmatmul.bf16.gmra.mxu1 %v3640_v13 }
 0x11c   : > { %1152 = vmatmul.bf16.gmra.mxu2 %v3648_v18 }
 0x11d   : > { %1073 = vmatmul.bf16.gmra.mxu1 %v3650_v19 }
 0x12c   : > { %1157 = vmatmul.bf16.gmra.mxu2 %v3658_v24 }
 0x12d   : > { %1078 = vmatmul.bf16.gmra.mxu1 %v3660_v25 }
 0x13c   : > { %1162 = vmatmul.bf16.gmra.mxu2 %v3668_v30 }
 0x13d   : > { %1083 = vmatmul.bf16.gmra.mxu1 %v3670_v31 }
 0x14c   : > { %1167 = vmatmul.bf16.gmra.mxu2 %v3678_v36 }
 0x14d   : > { %1088 = vmatmul.bf16.gmra.mxu1 %v3680_v37 }
 0x15c   : > { %1172 = vmatmul.bf16.gmra.mxu2 %v3688_v42 }
 0x15d   : > { %1093 = vmatmul.bf16.gmra.mxu1 %v3690_v43 }
 0x16a   : > { %v1059_v50 = vpop.f32.mrf.mxu1 }
 0x16b   : > { %v1060_v11 = vadd.f32 %v3738_v9, %v1059_v50 }
 0x16c   : > { %1177 = vmatmul.bf16.gmra.mxu2 %v3698_v48 }
 0x16d   : > { %1098 = vmatmul.bf16.gmra.mxu1 %v3700_v49 }
 0x172   : > { %v1061_v51 = vpop.f32.mrf.mxu1 }
 0x173   : > { %v1062_v20 = vadd.f32 %v3738_v9, %v1061_v51 }
 0x17a   : > { %v1064_v61 = vpop.f32.mrf.mxu1 }
 0x17b   : > { %v1065_v35 = vadd.f32 %v3738_v9, %v1064_v61 }
 0x17c   : > { %1182 = vmatmul.bf16.gmra.mxu2 %v3714_v59 }
 0x17d   : > { %1103 = vmatmul.bf16.gmra.mxu1 %v3716_v60 }
 0x182   : > { %v1066_v0 = vpop.f32.mrf.mxu1 }
 0x183   : > { %v1067_v45 = vadd.f32 %v3738_v9, %v1066_v0 }
 0x18a   : > { %v1069_v8 = vpop.f32.mrf.mxu1 }
 0x18b   : > { %v1070_v61 = vadd.f32 %v3738_v9, %v1069_v8 }
 0x18c   : > { %1187 = vmatmul.bf16.gmra.mxu2 %v3730_v6 }
 0x18d   : > { %1108 = vmatmul.bf16.gmra.mxu1 %v3732_v7 }
 0x18f   : > { %v1148_v10 = vpop.f32.mrf.mxu2 }
 0x190   : > { %v1149_v15 = vadd.f32 %v1148_v10, %v1060_v11  ;;  %v3096_v10 = vld [vmem:[%s3621_s29 + $0xd4] sm:$0xf0] }
 0x191   : > { %v3775_v17 = vor.u32 %v3096_v10, %v2968_v5 }
 0x192   : > { %v1071_v14 = vpop.f32.mrf.mxu1  ;;  %3183 = vtanh.f32 %v1149_v15 }
 0x193   : > { %v1072_v4 = vadd.f32 %v3738_v9, %v1071_v14 }
 0x197   : > { %v1150_v23 = vpop.f32.mrf.mxu2 }
 0x198   : > { %v1151_v26 = vadd.f32 %v1150_v23, %v1062_v20  ;;  %v3184_v32 = vpop.eup %3183 }
 0x19a   : > { %3185 = vtanh.f32 %v1151_v26  ;;  %v1074_v29 = vpop.f32.mrf.mxu1 }
 0x19b   : > { %v1075_v22 = vadd.f32 %v3738_v9, %v1074_v29 }
 0x19c   : > { %1192 = vmatmul.bf16.gmra.mxu2 %v3747_v27 }
 0x19d   : > { %1113 = vmatmul.bf16.gmra.mxu1 %v3749_v28 }
 0x19f   : > { %v1153_v33 = vpop.f32.mrf.mxu2 }
 0x1a0   : > { %v3186_v34 = vpop.eup %3185  ;;  %v1154_v40 = vadd.f32 %v1153_v33, %v1065_v35  ;;  %v3093_v33 = vld [vmem:[%s3621_s29 + $0xc4] sm:$0xf] }
 0x1a1   : > { %v1260_v38 = vpack.c.bf16 %v3186_v34, %v3184_v32  ;;  %v2962_v34 = vld [vmem:[%s3621_s29 + $0xc8] sm:$0xf0] }
 0x1a2   : > { %v1076_v39 = vpop.f32.mrf.mxu1  ;;  %3187 = vtanh.f32 %v1154_v40  ;;  %v3098_v40 = vld [vmem:[%s3621_s29 + $0xe4] sm:$0xf0] }
 0x1a3   : > { %3006 = vmatmul.msk.bf16.vlgmr.msrb.gmra.mxu3 %vm1308_vm1, %v1260_v38  ;;  %v1077_v35 = vadd.f32 %v3738_v9, %v1076_v39  ;;  %v2976_v38 = vld [vmem:[%s3621_s29 + $0xe0] sm:$0xf] }
 0x1a4   : > { %v3788_v46 = vor.u32 %v3098_v40, %v2976_v38 }
 0x1a7   : > { %v1155_v50 = vpop.f32.mrf.mxu2 }
 0x1a8   : > { %v1156_v51 = vadd.f32 %v1155_v50, %v1067_v45  ;;  %v3188_v55 = vpop.eup %3187  ;;  %v3786_v45 = vor.u32 %v3093_v33, %v2962_v34  ;;  %v2978_v33 = vld [vmem:[%s3621_s29 + $0xe8] sm:$0xf0] }
 0x1aa   : > { %3189 = vtanh.f32 %v1156_v51  ;;  %v1079_v54 = vpop.f32.mrf.mxu1 }
 0x1ab   : > { %v1080_v51 = vadd.f32 %v3738_v9, %v1079_v54 }
 0x1ac   : > { %1197 = vmatmul.bf16.gmra.mxu2 %v3760_v52 }
 0x1ad   : > { %1118 = vmatmul.bf16.gmra.mxu1 %v3762_v53 }
 0x1af   : > { %v1158_v56 = vpop.f32.mrf.mxu2 }
 0x1b0   : > { %v3190_v58 = vpop.eup %3189  ;;  %v1159_v0 = vadd.f32 %v1158_v56, %v1070_v61  ;;  %v3095_v61 = vld [vmem:[%s3621_s29 + $0xd4] sm:$0xf] }
 0x1b1   : > { %v1261_v62 = vpack.c.bf16 %v3190_v58, %v3188_v55 }
 0x1b2   : > { %v1081_v63 = vpop.f32.mrf.mxu1  ;;  %3191 = vtanh.f32 %v1159_v0 }
 0x1b3   : > { %3007 = vmatmul.msk.bf16.gmra.mxu3 %vm1308_vm1, %v1261_v62  ;;  %v2970_v62 = vld [vmem:[%s3621_s29 + $0xd8] sm:$0xf0]  ;;  %v1082_v0 = vadd.f32 %v3738_v9, %v1081_v63 }
 0x1b4   : > { %v3799_v10 = vor.u32 %v3095_v61, %v2970_v62 }
 0x1b7   : > { %v1160_v11 = vpop.f32.mrf.mxu2 }
 0x1b8   : > { %v1161_v15 = vadd.f32 %v1160_v11, %v1072_v4  ;;  %v3192_v14 = vpop.eup %3191  ;;  %v3801_v11 = vor.u32 %v3100_v3, %v2984_v1 }
 0x1ba   : > { %3193 = vtanh.f32 %v1161_v15  ;;  %v1084_v8 = vpop.f32.mrf.mxu1 }
 0x1bc   : > { %1202 = vmatmul.bf16.gmra.mxu2 %v3773_v16 }
 0x1bd   : > { %1123 = vmatmul.bf16.gmra.mxu1 %v3775_v17 }
 0x1bf   : > { %v1163_v20 = vpop.f32.mrf.mxu2 }
 0x1c0   : > { %v3194_v21 = vpop.eup %3193  ;;  %v1164_v32 = vadd.f32 %v1163_v20, %v1075_v22  ;;  %v1085_v20 = vadd.f32 %v3738_v9, %v1084_v8 }
 0x1c1   : > { %v1262_v23 = vpack.c.bf16 %v3194_v21, %v3192_v14 }
 0x1c2   : > { %v1086_v26 = vpop.f32.mrf.mxu1  ;;  %3195 = vtanh.f32 %v1164_v32  ;;  %v3097_v32 = vld [vmem:[%s3621_s29 + $0xe4] sm:$0xf] }
 0x1c3   : > { %3008 = vmatmul.msk.bf16.gmra.mxu3 %vm1308_vm1, %v1262_v23  ;;  %v1087_v34 = vadd.f32 %v3738_v9, %v1086_v26  ;;  %v3810_v40 = vor.u32 %v3097_v32, %v2978_v33  ;;  %v3099_v26 = vld [vmem:[%s3621_s29 + $0xf4] sm:$0xf] }
 0x1c7   : > { %v1165_v41 = vpop.f32.mrf.mxu2 }
 0x1c8   : > { %v1166_v44 = vadd.f32 %v1165_v41, %v1077_v35  ;;  %v3196_v39 = vpop.eup %3195 }
 0x1ca   : > { %3197 = vtanh.f32 %v1166_v44  ;;  %v1089_v29 = vpop.f32.mrf.mxu1 }
 0x1cc   : > { %1207 = vmatmul.bf16.gmra.mxu2 %v3786_v45 }
 0x1cd   : > { %1128 = vmatmul.bf16.gmra.mxu1 %v3788_v46 }
 0x1cf   : > { %v1168_v47 = vpop.f32.mrf.mxu2 }
 0x1d0   : > { %v3198_v50 = vpop.eup %3197  ;;  %v1169_v58 = vadd.f32 %v1168_v47, %v1080_v51  ;;  %v1090_v47 = vadd.f32 %v3738_v9, %v1089_v29 }
 0x1d1   : > { %v1263_v55 = vpack.c.bf16 %v3198_v50, %v3196_v39 }
 0x1d2   : > { %v1091_v56 = vpop.f32.mrf.mxu1  ;;  %3199 = vtanh.f32 %v1169_v58 }
 0x1d3   : > { %3009 = vmatmul.msk.bf16.gmra.mxu3 %vm1308_vm1, %v1263_v55  ;;  %v2986_v55 = vld [vmem:[%s3621_s29 + $0xf8] sm:$0xf0]  ;;  %v1092_v58 = vadd.f32 %v3738_v9, %v1091_v56  ;;  %s2771_s29 = sshll.u32 %s3542_s12, 1 }
 0x1d4   : > { %v3818_v1 = vor.u32 %v3099_v26, %v2986_v55  ;;  %p560_p11 = scmp.lt.s32.totalorder %s2771_s29, 15 }
 0x1d6   : > { %s4430_s29 = smov (!%p560_p11, %s2771_s29), 15 }
 0x1d7   : > { %v1170_v4 = vpop.f32.mrf.mxu2  ;;  %s4033_s28 = sshll.u32 %s4430_s29, 3 }
 0x1d8   : > { %v1171_v5 = vadd.f32 %v1170_v4, %v1082_v0  ;;  %v3200_v15 = vpop.eup %3199  ;;  %s570_s30 = scalar_lea.vmem %s4399_s10, %s4033_s28  ;;  %s4248_s26 = scalar_lea.vmem %s4398_s9, %s4033_s28 }
 0x1da   : > { %3201 = vtanh.f32 %v1171_v5  ;;  %v1094_v54 = vpop.f32.mrf.mxu1 }
 0x1db   : > { %v1095_v5 = vadd.f32 %v3738_v9, %v1094_v54 }
 0x1dc   : > { %1212 = vmatmul.bf16.gmra.mxu2 %v3799_v10 }
 0x1dd   : > { %1133 = vmatmul.bf16.gmra.mxu1 %v3801_v11 }
 0x1df   : > { %v1173_v14 = vpop.f32.mrf.mxu2 }
 0x1e0   : > { %v3202_v63 = vpop.eup %3201  ;;  %v1174_v23 = vadd.f32 %v1173_v14, %v1085_v20 }
 0x1e1   : > { %v1264_v21 = vpack.c.bf16 %v3202_v63, %v3200_v15 }
 0x1e2   : > { %v1096_v22 = vpop.f32.mrf.mxu1  ;;  %3203 = vtanh.f32 %v1174_v23 }
 0x1e3   : > { %3010 = vmatmul.msk.bf16.gmra.mxu3 %vm1308_vm1, %v1264_v21  ;;  %v1097_v56 = vadd.f32 %v3738_v9, %v1096_v22 }
 0x1e7   : > { %v1175_v35 = vpop.f32.mrf.mxu2 }
 0x1e8   : > { %v1176_v38 = vadd.f32 %v1175_v35, %v1087_v34  ;;  %v3204_v41 = vpop.eup %3203 }
 0x1ea   : > { %3205 = vtanh.f32 %v1176_v38  ;;  %v1099_v8 = vpop.f32.mrf.mxu1 }
 0x1eb   : > { %v1100_v35 = vadd.f32 %v3738_v9, %v1099_v8 }
 0x1ec   : > { %1217 = vmatmul.bf16.gmra.mxu2 %v3810_v40 }
 0x1ef   : > { %v1178_v44 = vpop.f32.mrf.mxu2 }
 0x1f0   : > { %v3206_v39 = vpop.eup %3205  ;;  %v1179_v51 = vadd.f32 %v1178_v44, %v1090_v47 }
 0x1f1   : > { %v1265_v50 = vpack.c.bf16 %v3206_v39, %v3204_v41 }
 0x1f2   : > { %v1101_v62 = vpop.f32.mrf.mxu1  ;;  %3207 = vtanh.f32 %v1179_v51 }
 0x1f3   : > { %3011 = vmatmul.msk.bf16.gmra.mxu3 %vm1308_vm1, %v1265_v50  ;;  %v1102_v44 = vadd.f32 %v3738_v9, %v1101_v62 }
 0x1f7   : > { %v1180_v61 = vpop.f32.mrf.mxu2 }
 0x1f8   : > { %v1181_v0 = vadd.f32 %v1180_v61, %v1092_v58  ;;  %v3208_v3 = vpop.eup %3207 }
 0x1fa   : > { %3209 = vtanh.f32 %v1181_v0  ;;  %v1104_v14 = vpop.f32.mrf.mxu1 }
 0x1fb   : > { %v1105_v55 = vadd.f32 %v3738_v9, %v1104_v14 }
 0x1fc   : > { %1222 = vmatmul.bf16.gmra.mxu2 %v3818_v1 }
 0x1ff   : > { %v1183_v4 = vpop.f32.mrf.mxu2 }
 0x200   : > { %v3210_v29 = vpop.eup %3209  ;;  %v1184_v63 = vadd.f32 %v1183_v4, %v1095_v5 }
 0x201   : > { %v1266_v15 = vpack.c.bf16 %v3210_v29, %v3208_v3 }
 0x202   : > { %3211 = vtanh.f32 %v1184_v63  ;;  %v1106_v23 = vpop.f32.mrf.mxu1 }
 0x203   : > { %3012 = vmatmul.msk.bf16.gmra.mxu3 %vm1308_vm1, %v1266_v15  ;;  %v1107_v61 = vadd.f32 %v3738_v9, %v1106_v23 }
 0x207   : > { %v1185_v20 = vpop.f32.mrf.mxu2 }
 0x208   : > { %v1186_v21 = vadd.f32 %v1185_v20, %v1097_v56  ;;  %v3212_v32 = vpop.eup %3211 }
 0x20a   : > { %3213 = vtanh.f32 %v1186_v21  ;;  %v1109_v41 = vpop.f32.mrf.mxu1 }
 0x20b   : > { %v1110_v56 = vadd.f32 %v3738_v9, %v1109_v41 }
 0x20f   : > { %v1188_v33 = vpop.f32.mrf.mxu2 }
 0x210   : > { %v3214_v34 = vpop.eup %3213  ;;  %v1189_v54 = vadd.f32 %v1188_v33, %v1100_v35 }
 0x211   : > { %v1267_v38 = vpack.c.bf16 %v3214_v34, %v3212_v32 }
 0x212   : > { %3215 = vtanh.f32 %v1189_v54  ;;  %v1111_v51 = vpop.f32.mrf.mxu1 }
 0x213   : > { %3013 = vmatmul.msk.bf16.gmra.mxu3 %vm1308_vm1, %v1267_v38  ;;  %v1112_v32 = vadd.f32 %v3738_v9, %v1111_v51 }
 0x217   : > { %v1190_v39 = vpop.f32.mrf.mxu2 }
 0x218   : > { %v1191_v47 = vadd.f32 %v1190_v39, %v1102_v44  ;;  %v3216_v22 = vpop.eup %3215 }
 0x21a   : > { %3217 = vtanh.f32 %v1191_v47  ;;  %v1114_v4 = vpop.f32.mrf.mxu1 }
 0x21f   : > { %v1193_v50 = vpop.f32.mrf.mxu2 }
 0x220   : > { %v3218_v26 = vpop.eup %3217  ;;  %v1194_v8 = vadd.f32 %v1193_v50, %v1105_v55 }
 0x221   : > { %v1268_v58 = vpack.c.bf16 %v3218_v26, %v3216_v22  ;;  %v1115_v22 = vadd.f32 %v3738_v9, %v1114_v4 }
 0x222   : > { %3219 = vtanh.f32 %v1194_v8  ;;  %v1116_v21 = vpop.f32.mrf.mxu1 }
 0x223   : > { %3014 = vmatmul.msk.bf16.gmra.mxu3 %vm1308_vm1, %v1268_v58  ;;  %v1117_v26 = vadd.f32 %v3738_v9, %v1116_v21 }
 0x226   : > { %v3830_v0 = vpop.f32.mrf.mxu3 }
 0x227   : > { %v1195_v3 = vpop.f32.mrf.mxu2 }
 0x228   : > { %v1196_v62 = vadd.f32 %v1195_v3, %v1107_v61  ;;  %v3220_v5 = vpop.eup %3219 }
 0x22a   : > { %3221 = vtanh.f32 %v1196_v62  ;;  %v1119_v38 = vpop.f32.mrf.mxu1 }
 0x22e   : > { %v3832_v29 = vpop.f32.mrf.mxu3 }
 0x22f   : > { %v1198_v15 = vpop.f32.mrf.mxu2  ;;  %v1446_v14 = vpack.c.bf16 %v3832_v29, %v3830_v0 }
 0x230   : > { %v3222_v63 = vpop.eup %3221  ;;  %v1199_v23 = vadd.f32 %v1198_v15, %v1110_v56 }
 0x231   : > { %v1269_v20 = vpack.c.bf16 %v3222_v63, %v3220_v5  ;;  %v1120_v63 = vadd.f32 %v3738_v9, %v1119_v38 }
 0x232   : > { %3223 = vtanh.f32 %v1199_v23  ;;  %v1121_v8 = vpop.f32.mrf.mxu1 }
 0x233   : > { %3015 = vmatmul.msk.bf16.gmra.mxu3 %vm1308_vm1, %v1269_v20  ;;  %v1122_v23 = vadd.f32 %v3738_v9, %v1121_v8 }
 0x236   : > { %v3839_v33 = vpop.f32.mrf.mxu3 }
 0x237   : > { %v1200_v34 = vpop.f32.mrf.mxu2 }
 0x238   : > { %v1201_v35 = vadd.f32 %v1200_v34, %v1112_v32  ;;  %v3224_v44 = vpop.eup %3223 }
 0x23a   : > { %3225 = vtanh.f32 %v1201_v35  ;;  %v1124_v20 = vpop.f32.mrf.mxu1 }
 0x23e   : > { %v3841_v54 = vpop.f32.mrf.mxu3 }
 0x23f   : > { %v1203_v39 = vpop.f32.mrf.mxu2  ;;  %v1447_v41 = vpack.c.bf16 %v3841_v54, %v3839_v33 }
 0x240   : > { %v3226_v47 = vpop.eup %3225  ;;  %v1204_v51 = vadd.f32 %v1203_v39, %v1115_v22 }
 0x241   : > { %v1270_v50 = vpack.c.bf16 %v3226_v47, %v3224_v44 }
 0x242   : > { %3227 = vtanh.f32 %v1204_v51  ;;  %v1126_v44 = vpop.f32.mrf.mxu1  ;;  %v1125_v51 = vadd.f32 %v3738_v9, %v1124_v20 }
 0x243   : > { %3016 = vmatmul.msk.bf16.gmra.mxu3 %vm1308_vm1, %v1270_v50 }
 0x246   : > { %v3848_v55 = vpop.f32.mrf.mxu3 }
 0x247   : > { %v1205_v58 = vpop.f32.mrf.mxu2 }
 0x248   : > { %v1206_v61 = vadd.f32 %v1205_v58, %v1117_v26  ;;  %v3228_v62 = vpop.eup %3227 }
 0x24a   : > { %3229 = vtanh.f32 %v1206_v61  ;;  %v1129_v8 = vpop.f32.mrf.mxu1  ;;  %v1127_v61 = vadd.f32 %v3738_v9, %v1126_v44 }
 0x24e   : > { %v3850_v3 = vpop.f32.mrf.mxu3 }
 0x24f   : > { %v1208_v5 = vpop.f32.mrf.mxu2  ;;  %v1448_v4 = vpack.c.bf16 %v3850_v3, %v3848_v55 }
 0x250   : > { %v3230_v15 = vpop.eup %3229  ;;  %v1209_v21 = vadd.f32 %v1208_v5, %v1120_v63 }
 0x251   : > { %v1271_v56 = vpack.c.bf16 %v3230_v15, %v3228_v62 }
 0x252   : > { %3231 = vtanh.f32 %v1209_v21  ;;  %v1131_v21 = vpop.f32.mrf.mxu1 }
 0x253   : > { %3017 = vmatmul.msk.bf16.gmra.mxu3 %vm1308_vm1, %v1271_v56 }
 0x256   : > { %v3857_v32 = vpop.f32.mrf.mxu3 }
 0x257   : > { %v1210_v34 = vpop.f32.mrf.mxu2 }
 0x258   : > { %v1211_v35 = vadd.f32 %v1210_v34, %v1122_v23  ;;  %v3232_v47 = vpop.eup %3231  ;;  %v1130_v34 = vadd.f32 %v3738_v9, %v1129_v8 }
 0x25a   : > { %3233 = vtanh.f32 %v1211_v35 }
 0x25e   : > { %v3859_v39 = vpop.f32.mrf.mxu3 }
 0x25f   : > { %v1213_v22 = vpop.f32.mrf.mxu2  ;;  %v1449_v38 = vpack.c.bf16 %v3859_v39, %v3857_v32  ;;  %v1132_v39 = vadd.f32 %v3738_v9, %v1131_v21 }
 0x260   : > { %v3234_v50 = vpop.eup %3233  ;;  %v1214_v58 = vadd.f32 %v1213_v22, %v1125_v51 }
 0x261   : > { %v1272_v26 = vpack.c.bf16 %v3234_v50, %v3232_v47  ;;  %v1134_v50 = vpop.f32.mrf.mxu1 }
 0x262   : > { %3235 = vtanh.f32 %v1214_v58 }
 0x263   : > { %3018 = vmatmul.msk.bf16.gmra.mxu3 %vm1308_vm1, %v1272_v26 }
 0x266   : > { %v1386_v62 = vpop.f32.mrf.mxu3 }
 0x267   : > { %v1215_v5 = vpop.f32.mrf.mxu2 }
 0x268   : > { %v1216_v15 = vadd.f32 %v1215_v5, %v1127_v61  ;;  %v3236_v56 = vpop.eup %3235  ;;  %v1135_v5 = vadd.f32 %v3738_v9, %v1134_v50 }
 0x269   : > { %v1136_v8 = vpop.f32.mrf.mxu1 }
 0x26a   : > { %3237 = vtanh.f32 %v1216_v15 }
 0x26e   : > { %v1388_v63 = vpop.f32.mrf.mxu3 }
 0x26f   : > { %v1218_v23 = vpop.f32.mrf.mxu2 }
 0x270   : > { %v3238_v32 = vpop.eup %3237  ;;  %v1219_v35 = vadd.f32 %v1218_v23, %v1130_v34  ;;  %v1137_v23 = vadd.f32 %v3738_v9, %v1136_v8  ;;  %v1450_v9 = vpack.c.bf16 %v1388_v63, %v1386_v62 }
 0x271   : > { %v1273_v20 = vpack.c.bf16 %v3238_v32, %v3236_v56 }
 0x272   : > { %3239 = vtanh.f32 %v1219_v35 }
 0x273   : > { %3019 = vmatmul.msk.bf16.gmra.mxu3 %vm1308_vm1, %v1273_v20 }
 0x276   : > { %v1391_v47 = vpop.f32.mrf.mxu3 }
 0x277   : > { %v1220_v44 = vpop.f32.mrf.mxu2 }
 0x278   : > { %v1221_v22 = vadd.f32 %v1220_v44, %v1132_v39  ;;  %v3240_v26 = vpop.eup %3239 }
 0x27a   : > { %3241 = vtanh.f32 %v1221_v22 }
 0x27e   : > { %v1393_v51 = vpop.f32.mrf.mxu3 }
 0x27f   : > { %v1223_v58 = vpop.f32.mrf.mxu2 }
 0x280   : > { %v3242_v61 = vpop.eup %3241  ;;  %v1224_v56 = vadd.f32 %v1223_v58, %v1135_v5  ;;  %v1451_v5 = vpack.c.bf16 %v1393_v51, %v1391_v47 }
 0x281   : > { %v1274_v15 = vpack.c.bf16 %v3242_v61, %v3240_v26 }
 0x282   : > { %3243 = vtanh.f32 %v1224_v56 }
 0x283   : > { %3020 = vmatmul.msk.bf16.gmra.mxu3 %vm1308_vm1, %v1274_v15 }
 0x286   : > { %v1396_v21 = vpop.f32.mrf.mxu3 }
 0x287   : > { %v1225_v32 = vpop.f32.mrf.mxu2 }
 0x288   : > { %v1226_v34 = vadd.f32 %v1225_v32, %v1137_v23  ;;  %v3244_v35 = vpop.eup %3243 }
 0x28a   : > { %3245 = vtanh.f32 %v1226_v34 }
 0x28e   : > { %v1398_v20 = vpop.f32.mrf.mxu3 }
 0x28f   : > { %v1452_v61 = vpack.c.bf16 %v1398_v20, %v1396_v21 }
 0x290   : > { %v3246_v39 = vpop.eup %3245 }
 0x291   : > { %v1275_v44 = vpack.c.bf16 %v3246_v39, %v3244_v35  ;;  %v3125_v39 = vld [vmem:[%s4395_s6 + $0x18] sm:$0xff] }
 0x292   : > { %1776 = vmatpush.bf16.msra.mxu1 %v3125_v39 }
 0x293   : > { %3021 = vmatmul.msk.bf16.gmra.mxu3 %vm1308_vm1, %v1275_v44 }
 0x296   : > { %v1401_v22 = vpop.f32.mrf.mxu3 }
 0x29e   : > { %v1403_v50 = vpop.f32.mrf.mxu3 }
 0x29f   : > { %v1453_v26 = vpack.c.bf16 %v1403_v50, %v1401_v22 }
 0x2a1   : > { %1466 = vmatpush.bf16.msrb.mxu0 %v1453_v26  ;;  %v3124_v26 = vld [vmem:[%s4395_s6 + $0x10] sm:$0xff] }
 0x2a2   : > { %1777 = vmatpush.bf16.msra.mxu1 %v3124_v26 }
 0x2a5   : > { %1467 = vmatpush.bf16.msrb.mxu0 %v1452_v61  ;;  %v3123_v61 = vld [vmem:[%s4395_s6 + $0x8] sm:$0xff] }
 0x2a6   : > { %v1406_v58 = vpop.f32.mrf.mxu3  ;;  %1778 = vmatpush.bf16.msra.mxu1 %v3123_v61 }
 0x2a9   : > { %1468 = vmatpush.bf16.msrb.mxu0 %v1451_v5  ;;  %v3122_v5 = vld [vmem:[%s4395_s6] sm:$0xff] }
 0x2aa   : > { %1779 = vmatpush.bf16.msra.mxu1 %v3122_v5 }
 0x2ad   : > { %1469 = vmatpush.bf16.msrb.mxu0 %v1450_v9 }
 0x2ae   : > { %v1408_v15 = vpop.f32.mrf.mxu3 }
 0x2af   : > { %v1454_v35 = vpack.c.bf16 %v1408_v15, %v1406_v58  ;;  %v3920_v15 = vld [vmem:[%s4418_s5] ss:$0 sm:$0xff] }
 0x2b1   : > { %1470 = vmatpush.bf16.msrb.mxu0 %v1449_v38 }
 0x2b5   : > { %1471 = vmatpush.bf16.msrb.mxu0 %v1448_v4 }
 0x2b6   : > { %v1411_v8 = vpop.f32.mrf.mxu3 }
 0x2b9   : > { %1472 = vmatpush.bf16.msrb.mxu0 %v1447_v41 }
 0x2bd   : > { %1473 = vmatpush.bf16.msrb.mxu0 %v1446_v14 }
 0x2be   : > { %v1413_v56 = vpop.f32.mrf.mxu3 }
 0x2bf   : > { %v1455_v20 = vpack.c.bf16 %v1413_v56, %v1411_v8 }
 0x2c0   : > { %1474 = vmatmul.bf16.vlgmr.msrb.gmra.mxu0 %v3625_v57 }
 0x2c6   : > { %v1416_v62 = vpop.f32.mrf.mxu3 }
 0x2ce   : > { %v1418_v63 = vpop.f32.mrf.mxu3 }
 0x2cf   : > { %v1456_v34 = vpack.c.bf16 %v1418_v63, %v1416_v62 }
 0x2d0   : > { %1479 = vmatmul.bf16.gmra.mxu0 %v3630_v2 }
 0x2d6   : > { %v1421_v38 = vpop.f32.mrf.mxu3 }
 0x2de   : > { %v1423_v47 = vpop.f32.mrf.mxu3 }
 0x2df   : > { %v1457_v32 = vpack.c.bf16 %v1423_v47, %v1421_v38 }
 0x2e0   : > { %1484 = vmatmul.bf16.gmra.mxu0 %v3640_v13 }
 0x2e6   : > { %v1426_v55 = vpop.f32.mrf.mxu3 }
 0x2ee   : > { %v1428_v3 = vpop.f32.mrf.mxu3 }
 0x2ef   : > { %v1458_v21 = vpack.c.bf16 %v1428_v3, %v1426_v55 }
 0x2f0   : > { %1489 = vmatmul.bf16.gmra.mxu0 %v3650_v19 }
 0x2f6   : > { %v1431_v33 = vpop.f32.mrf.mxu3 }
 0x2fe   : > { %v1433_v54 = vpop.f32.mrf.mxu3 }
 0x2ff   : > { %v1459_v23 = vpack.c.bf16 %v1433_v54, %v1431_v33 }
 0x300   : > { %1494 = vmatmul.bf16.gmra.mxu0 %v3660_v25 }
 0x306   : > { %v1436_v0 = vpop.f32.mrf.mxu3 }
 0x30e   : > { %v1438_v29 = vpop.f32.mrf.mxu3 }
 0x30f   : > { %v1460_v51 = vpack.c.bf16 %v1438_v29, %v1436_v0 }
 0x310   : > { %1499 = vmatmul.bf16.gmra.mxu0 %v3670_v31 }
 0x316   : > { %v1441_v14 = vpop.f32.mrf.mxu3 }
 0x31e   : > { %v1443_v41 = vpop.f32.mrf.mxu3 }
 0x31f   : > { %v1461_v4 = vpack.c.bf16 %v1443_v41, %v1441_v14 }
 0x320   : > { %1504 = vmatmul.bf16.gmra.mxu0 %v3680_v37 }
 0x321   : > { %1555 = vmatpush.bf16.msra.mxu3 %v1461_v4 }
 0x325   : > { %1556 = vmatpush.bf16.msra.mxu3 %v1460_v51 }
 0x329   : > { %1557 = vmatpush.bf16.msra.mxu3 %v1459_v23 }
 0x32d   : > { %1558 = vmatpush.bf16.msra.mxu3 %v1458_v21 }
 0x330   : > { %1509 = vmatmul.bf16.gmra.mxu0 %v3690_v43 }
 0x331   : > { %1559 = vmatpush.bf16.msra.mxu3 %v1457_v32 }
 0x335   : > { %1560 = vmatpush.bf16.msra.mxu3 %v1456_v34 }
 0x339   : > { %1561 = vmatpush.bf16.msra.mxu3 %v1455_v20 }
 0x33d   : > { %1562 = vmatpush.bf16.msra.mxu3 %v1454_v35  ;;  %v1475_v44 = vpop.f32.mrf.mxu0 }
 0x33e   : > { %v1476_v62 = vadd.f32 %v3920_v15, %v1475_v44 }
 0x340   : > { %1563 = vmatmul.bf16.vlgmr.msra.gmra.mxu3 %v3638_v12  ;;  %1514 = vmatmul.bf16.gmra.mxu0 %v3700_v49 }
 0x345   : > { %v1477_v22 = vpop.f32.mrf.mxu0 }
 0x346   : > { %v1478_v47 = vadd.f32 %v3920_v15, %v1477_v22 }
 0x34d   : > { %v1480_v50 = vpop.f32.mrf.mxu0 }
 0x34e   : > { %v1481_v14 = vadd.f32 %v3920_v15, %v1480_v50 }
 0x350   : > { %1568 = vmatmul.bf16.gmra.mxu3 %v3648_v18  ;;  %1519 = vmatmul.bf16.gmra.mxu0 %v3716_v60 }
 0x355   : > { %v1482_v58 = vpop.f32.mrf.mxu0 }
 0x356   : > { %v1483_v23 = vadd.f32 %v3920_v15, %v1482_v58 }
 0x35d   : > { %v1485_v9 = vpop.f32.mrf.mxu0 }
 0x35e   : > { %v1486_v44 = vadd.f32 %v3920_v15, %v1485_v9 }
 0x360   : > { %1573 = vmatmul.bf16.gmra.mxu3 %v3658_v24  ;;  %1524 = vmatmul.bf16.gmra.mxu0 %v3732_v7 }
 0x365   : > { %v1487_v8 = vpop.f32.mrf.mxu0 }
 0x366   : > { %v1488_v61 = vadd.f32 %v3920_v15, %v1487_v8 }
 0x36d   : > { %v1490_v38 = vpop.f32.mrf.mxu0 }
 0x370   : > { %1578 = vmatmul.bf16.gmra.mxu3 %v3668_v30  ;;  %1529 = vmatmul.bf16.gmra.mxu0 %v3749_v28 }
 0x375   : > { %v1492_v33 = vpop.f32.mrf.mxu0 }
 0x37d   : > { %v1495_v51 = vpop.f32.mrf.mxu0 }
 0x380   : > { %1583 = vmatmul.bf16.gmra.mxu3 %v3678_v36  ;;  %1534 = vmatmul.bf16.gmra.mxu0 %v3762_v53 }
 0x385   : > { %v1497_v34 = vpop.f32.mrf.mxu0 }
 0x38d   : > { %v1500_v26 = vpop.f32.mrf.mxu0 }
 0x390   : > { %1588 = vmatmul.bf16.gmra.mxu3 %v3688_v42  ;;  %1539 = vmatmul.bf16.gmra.mxu0 %v3775_v17 }
 0x3a0   : > { %1593 = vmatmul.bf16.gmra.mxu3 %v3698_v48  ;;  %1544 = vmatmul.bf16.gmra.mxu0 %v3788_v46 }
 0x3b0   : > { %1598 = vmatmul.bf16.gmra.mxu3 %v3714_v59  ;;  %1549 = vmatmul.bf16.gmra.mxu0 %v3801_v11 }
 0x3c0   : > { %1603 = vmatmul.bf16.gmra.mxu3 %v3730_v6 }
 0x3c3   : > { %v1564_v56 = vpop.f32.mrf.mxu3 }
 0x3c4   : > { %v1565_v63 = vadd.f32 %v1564_v56, %v1476_v62  ;;  %v1502_v56 = vpop.f32.mrf.mxu0 }
 0x3c6   : > { %3247 = vtanh.f32 %v1565_v63 }
 0x3cb   : > { %v1566_v55 = vpop.f32.mrf.mxu3 }
 0x3cc   : > { %v1567_v3 = vadd.f32 %v1566_v55, %v1478_v47  ;;  %v3248_v54 = vpop.eup %3247  ;;  %v1491_v55 = vadd.f32 %v3920_v15, %v1490_v38 }
 0x3ce   : > { %3249 = vtanh.f32 %v1567_v3 }
 0x3d0   : > { %1608 = vmatmul.bf16.gmra.mxu3 %v3747_v27 }
 0x3d3   : > { %v1569_v0 = vpop.f32.mrf.mxu3 }
 0x3d4   : > { %v3250_v29 = vpop.eup %3249  ;;  %v1570_v4 = vadd.f32 %v1569_v0, %v1481_v14  ;;  %v1493_v0 = vadd.f32 %v3920_v15, %v1492_v33 }
 0x3d5   : > { %v1676_v41 = vpack.c.bf16 %v3250_v29, %v3248_v54  ;;  %v1505_v54 = vpop.f32.mrf.mxu0 }
 0x3d6   : > { %3251 = vtanh.f32 %v1570_v4 }
 0x3d7   : > { %3038 = vmatmul.msk.bf16.vlgmr.msra.gmra.mxu1 %vm1308_vm1, %v1676_v41 }
 0x3db   : > { %v1571_v21 = vpop.f32.mrf.mxu3 }
 0x3dc   : > { %v1572_v32 = vadd.f32 %v1571_v21, %v1483_v23  ;;  %v3252_v20 = vpop.eup %3251  ;;  %v1496_v21 = vadd.f32 %v3920_v15, %v1495_v51 }
 0x3dd   : > { %v1507_v4 = vpop.f32.mrf.mxu0 }
 0x3de   : > { %3253 = vtanh.f32 %v1572_v32 }
 0x3e0   : > { %1613 = vmatmul.bf16.gmra.mxu3 %v3760_v52 }
 0x3e3   : > { %v1574_v35 = vpop.f32.mrf.mxu3 }
 0x3e4   : > { %v3254_v39 = vpop.eup %3253  ;;  %v1575_v50 = vadd.f32 %v1574_v35, %v1486_v44 }
 0x3e5   : > { %v1677_v22 = vpack.c.bf16 %v3254_v39, %v3252_v20  ;;  %v1498_v20 = vadd.f32 %v3920_v15, %v1497_v34  ;;  %v1510_v39 = vpop.f32.mrf.mxu0 }
 0x3e6   : > { %3255 = vtanh.f32 %v1575_v50 }
 0x3e7   : > { %3039 = vmatmul.msk.bf16.gmra.mxu1 %vm1308_vm1, %v1677_v22 }
 0x3eb   : > { %v1576_v58 = vpop.f32.mrf.mxu3 }
 0x3ec   : > { %v1577_v5 = vadd.f32 %v1576_v58, %v1488_v61  ;;  %v3256_v62 = vpop.eup %3255  ;;  %v1501_v61 = vadd.f32 %v3920_v15, %v1500_v26 }
 0x3ed   : > { %v1512_v51 = vpop.f32.mrf.mxu0 }
 0x3ee   : > { %3257 = vtanh.f32 %v1577_v5 }
 0x3f0   : > { %1618 = vmatmul.bf16.gmra.mxu3 %v3773_v16 }
 0x3f3   : > { %v1579_v63 = vpop.f32.mrf.mxu3 }
 0x3f4   : > { %v3258_v47 = vpop.eup %3257  ;;  %v1580_v3 = vadd.f32 %v1579_v63, %v1491_v55 }
 0x3f5   : > { %v1678_v9 = vpack.c.bf16 %v3258_v47, %v3256_v62  ;;  %v1503_v62 = vadd.f32 %v3920_v15, %v1502_v56  ;;  %v1515_v47 = vpop.f32.mrf.mxu0 }
 0x3f6   : > { %3259 = vtanh.f32 %v1580_v3 }
 0x3f7   : > { %3040 = vmatmul.msk.bf16.gmra.mxu1 %vm1308_vm1, %v1678_v9 }
 0x3fb   : > { %v1581_v8 = vpop.f32.mrf.mxu3 }
 0x3fc   : > { %v1582_v29 = vadd.f32 %v1581_v8, %v1493_v0  ;;  %v3260_v14 = vpop.eup %3259  ;;  %v1506_v0 = vadd.f32 %v3920_v15, %v1505_v54 }
 0x3fd   : > { %v1517_v56 = vpop.f32.mrf.mxu0 }
 0x3fe   : > { %3261 = vtanh.f32 %v1582_v29  ;;  %v1508_v29 = vadd.f32 %v3920_v15, %v1507_v4 }
 0x400   : > { %1623 = vmatmul.bf16.gmra.mxu3 %v3786_v45 }
 0x403   : > { %v1584_v41 = vpop.f32.mrf.mxu3 }
 0x404   : > { %v3262_v23 = vpop.eup %3261  ;;  %v1585_v32 = vadd.f32 %v1584_v41, %v1496_v21 }
 0x405   : > { %v1679_v38 = vpack.c.bf16 %v3262_v23, %v3260_v14  ;;  %v1520_v54 = vpop.f32.mrf.mxu0 }
 0x406   : > { %3263 = vtanh.f32 %v1585_v32  ;;  %v1511_v32 = vadd.f32 %v3920_v15, %v1510_v39 }
 0x407   : > { %3041 = vmatmul.msk.bf16.gmra.mxu1 %vm1308_vm1, %v1679_v38 }
 0x40b   : > { %v1586_v35 = vpop.f32.mrf.mxu3 }
 0x40c   : > { %v1587_v33 = vadd.f32 %v1586_v35, %v1498_v20  ;;  %v3264_v44 = vpop.eup %3263 }
 0x40e   : > { %3265 = vtanh.f32 %v1587_v33  ;;  %v1513_v33 = vadd.f32 %v3920_v15, %v1512_v51 }
 0x410   : > { %1628 = vmatmul.bf16.gmra.mxu3 %v3799_v10 }
 0x413   : > { %v1589_v22 = vpop.f32.mrf.mxu3 }
 0x414   : > { %v3266_v50 = vpop.eup %3265  ;;  %v1590_v5 = vadd.f32 %v1589_v22, %v1501_v61  ;;  %v1522_v22 = vpop.f32.mrf.mxu0 }
 0x415   : > { %v1680_v58 = vpack.c.bf16 %v3266_v50, %v3264_v44 }
 0x416   : > { %3267 = vtanh.f32 %v1590_v5  ;;  %v1516_v5 = vadd.f32 %v3920_v15, %v1515_v47 }
 0x417   : > { %3042 = vmatmul.msk.bf16.gmra.mxu1 %vm1308_vm1, %v1680_v58 }
 0x41b   : > { %v1591_v34 = vpop.f32.mrf.mxu3 }
 0x41c   : > { %v1592_v63 = vadd.f32 %v1591_v34, %v1503_v62  ;;  %v3268_v55 = vpop.eup %3267  ;;  %v1525_v34 = vpop.f32.mrf.mxu0 }
 0x41e   : > { %3269 = vtanh.f32 %v1592_v63  ;;  %v1518_v63 = vadd.f32 %v3920_v15, %v1517_v56 }
 0x420   : > { %1633 = vmatmul.bf16.gmra.mxu3 %v3810_v40 }
 0x423   : > { %v1594_v9 = vpop.f32.mrf.mxu3 }
 0x424   : > { %v3270_v3 = vpop.eup %3269  ;;  %v1595_v8 = vadd.f32 %v1594_v9, %v1506_v0  ;;  %v1527_v0 = vpop.f32.mrf.mxu0 }
 0x425   : > { %v1681_v26 = vpack.c.bf16 %v3270_v3, %v3268_v55 }
 0x426   : > { %3271 = vtanh.f32 %v1595_v8 }
 0x427   : > { %3043 = vmatmul.msk.bf16.gmra.mxu1 %vm1308_vm1, %v1681_v26 }
 0x42b   : > { %v1596_v14 = vpop.f32.mrf.mxu3 }
 0x42c   : > { %v1597_v41 = vadd.f32 %v1596_v14, %v1508_v29  ;;  %v3272_v23 = vpop.eup %3271  ;;  %v1521_v29 = vadd.f32 %v3920_v15, %v1520_v54 }
 0x42e   : > { %3273 = vtanh.f32 %v1597_v41  ;;  %v1523_v41 = vadd.f32 %v3920_v15, %v1522_v22 }
 0x430   : > { %1638 = vmatmul.bf16.gmra.mxu3 %v3818_v1 }
 0x433   : > { %v1599_v21 = vpop.f32.mrf.mxu3 }
 0x434   : > { %v3274_v38 = vpop.eup %3273  ;;  %v1600_v35 = vadd.f32 %v1599_v21, %v1511_v32  ;;  %v1530_v32 = vpop.f32.mrf.mxu0 }
 0x435   : > { %v1682_v20 = vpack.c.bf16 %v3274_v38, %v3272_v23 }
 0x436   : > { %3275 = vtanh.f32 %v1600_v35 }
 0x437   : > { %3044 = vmatmul.msk.bf16.gmra.mxu1 %vm1308_vm1, %v1682_v20 }
 0x43b   : > { %v1601_v4 = vpop.f32.mrf.mxu3 }
 0x43c   : > { %v1602_v44 = vadd.f32 %v1601_v4, %v1513_v33  ;;  %v3276_v50 = vpop.eup %3275  ;;  %v1526_v4 = vadd.f32 %v3920_v15, %v1525_v34  ;;  %v1532_v22 = vpop.f32.mrf.mxu0 }
 0x43e   : > { %3277 = vtanh.f32 %v1602_v44 }
 0x443   : > { %v1604_v61 = vpop.f32.mrf.mxu3 }
 0x444   : > { %v3278_v58 = vpop.eup %3277  ;;  %v1605_v39 = vadd.f32 %v1604_v61, %v1516_v5  ;;  %v1528_v61 = vadd.f32 %v3920_v15, %v1527_v0 }
 0x445   : > { %v1683_v62 = vpack.c.bf16 %v3278_v58, %v3276_v50 }
 0x446   : > { %3279 = vtanh.f32 %v1605_v39 }
 0x447   : > { %3045 = vmatmul.msk.bf16.gmra.mxu1 %vm1308_vm1, %v1683_v62 }
 0x44b   : > { %v1606_v55 = vpop.f32.mrf.mxu3 }
 0x44c   : > { %v1607_v9 = vadd.f32 %v1606_v55, %v1518_v63  ;;  %v3280_v51 = vpop.eup %3279  ;;  %v1535_v63 = vpop.f32.mrf.mxu0 }
 0x44e   : > { %3281 = vtanh.f32 %v1607_v9 }
 0x453   : > { %v1609_v3 = vpop.f32.mrf.mxu3 }
 0x454   : > { %v3282_v26 = vpop.eup %3281  ;;  %v3957_v8 = vpop.f32.mrf.mxu1  ;;  %v1610_v14 = vadd.f32 %v1609_v3, %v1521_v29  ;;  %v1531_v3 = vadd.f32 %v3920_v15, %v1530_v32  ;;  %v1533_v29 = vadd.f32 %v3920_v15, %v1532_v22 }
 0x455   : > { %v1684_v47 = vpack.c.bf16 %v3282_v26, %v3280_v51 }
 0x456   : > { %3283 = vtanh.f32 %v1610_v14  ;;  %v1537_v14 = vpop.f32.mrf.mxu0 }
 0x457   : > { %3046 = vmatmul.msk.bf16.gmra.mxu1 %vm1308_vm1, %v1684_v47 }
 0x45b   : > { %v1611_v23 = vpop.f32.mrf.mxu3 }
 0x45c   : > { %v1612_v56 = vadd.f32 %v1611_v23, %v1523_v41  ;;  %v3962_v21 = vpop.f32.mrf.mxu1  ;;  %v3284_v20 = vpop.eup %3283 }
 0x45e   : > { %3285 = vtanh.f32 %v1612_v56 }
 0x463   : > { %v1614_v35 = vpop.f32.mrf.mxu3 }
 0x464   : > { %v3286_v33 = vpop.eup %3285  ;;  %v3966_v54 = vpop.f32.mrf.mxu1  ;;  %v1615_v50 = vadd.f32 %v1614_v35, %v1526_v4  ;;  %v1536_v4 = vadd.f32 %v3920_v15, %v1535_v63 }
 0x465   : > { %v1685_v44 = vpack.c.bf16 %v3286_v33, %v3284_v20 }
 0x466   : > { %3287 = vtanh.f32 %v1615_v50  ;;  %v1540_v50 = vpop.f32.mrf.mxu0 }
 0x467   : > { %3047 = vmatmul.msk.bf16.gmra.mxu1 %vm1308_vm1, %v1685_v44 }
 0x46b   : > { %v1616_v58 = vpop.f32.mrf.mxu3 }
 0x46c   : > { %v1617_v5 = vadd.f32 %v1616_v58, %v1528_v61  ;;  %v3971_v62 = vpop.f32.mrf.mxu1  ;;  %v3288_v55 = vpop.eup %3287  ;;  %v1538_v61 = vadd.f32 %v3920_v15, %v1537_v14 }
 0x46e   : > { %3289 = vtanh.f32 %v1617_v5 }
 0x473   : > { %v1619_v9 = vpop.f32.mrf.mxu3 }
 0x474   : > { %v3290_v34 = vpop.eup %3289  ;;  %v3975_v51 = vpop.f32.mrf.mxu1  ;;  %v1620_v0 = vadd.f32 %v1619_v9, %v1531_v3 }
 0x475   : > { %v1686_v26 = vpack.c.bf16 %v3290_v34, %v3288_v55  ;;  %v1542_v34 = vpop.f32.mrf.mxu0 }
 0x476   : > { %3291 = vtanh.f32 %v1620_v0 }
 0x477   : > { %3048 = vmatmul.msk.bf16.gmra.mxu1 %vm1308_vm1, %v1686_v26 }
 0x47b   : > { %v1621_v47 = vpop.f32.mrf.mxu3 }
 0x47c   : > { %v1622_v41 = vadd.f32 %v1621_v47, %v1533_v29  ;;  %v3980_v23 = vpop.f32.mrf.mxu1  ;;  %v3292_v20 = vpop.eup %3291  ;;  %v1541_v29 = vadd.f32 %v3920_v15, %v1540_v50 }
 0x47e   : > { %3293 = vtanh.f32 %v1622_v41  ;;  %v1545_v41 = vpop.f32.mrf.mxu0 }
 0x47f   : > { %v1546_v38 = vadd.f32 %v3920_v15, %v1545_v41 }
 0x483   : > { %v1624_v35 = vpop.f32.mrf.mxu3 }
 0x484   : > { %v3294_v33 = vpop.eup %3293  ;;  %v3984_v32 = vpop.f32.mrf.mxu1  ;;  %v1625_v22 = vadd.f32 %v1624_v35, %v1536_v4 }
 0x485   : > { %v1687_v44 = vpack.c.bf16 %v3294_v33, %v3292_v20  ;;  %v1543_v20 = vadd.f32 %v3920_v15, %v1542_v34 }
 0x486   : > { %3295 = vtanh.f32 %v1625_v22  ;;  %v1547_v22 = vpop.f32.mrf.mxu0 }
 0x487   : > { %3049 = vmatmul.msk.bf16.gmra.mxu1 %vm1308_vm1, %v1687_v44 }
 0x48b   : > { %v1626_v58 = vpop.f32.mrf.mxu3 }
 0x48c   : > { %v1627_v5 = vadd.f32 %v1626_v58, %v1538_v61  ;;  %v3989_v55 = vpop.f32.mrf.mxu1  ;;  %v3296_v3 = vpop.eup %3295 }
 0x48d   : > { %v1864_v9 = vpack.c.bf16 %v3989_v55, %v3984_v32 }
 0x48e   : > { %3297 = vtanh.f32 %v1627_v5 }
 0x493   : > { %v1629_v26 = vpop.f32.mrf.mxu3 }
 0x494   : > { %v3298_v63 = vpop.eup %3297  ;;  %v1801_v0 = vpop.f32.mrf.mxu1  ;;  %v1630_v14 = vadd.f32 %v1629_v26, %v1541_v29  ;;  %v1548_v26 = vadd.f32 %v3920_v15, %v1547_v22 }
 0x495   : > { %v1688_v47 = vpack.c.bf16 %v3298_v63, %v3296_v3 }
 0x496   : > { %3299 = vtanh.f32 %v1630_v14 }
 0x497   : > { %3050 = vmatmul.msk.bf16.gmra.mxu1 %vm1308_vm1, %v1688_v47  ;;  %v1550_v47 = vpop.f32.mrf.mxu0 }
 0x498   : > { %v1551_v39 = vadd.f32 %v3920_v15, %v1550_v47 }
 0x49b   : > { %v1631_v35 = vpop.f32.mrf.mxu3 }
 0x49c   : > { %v1632_v33 = vadd.f32 %v1631_v35, %v1543_v20  ;;  %v1803_v4 = vpop.f32.mrf.mxu1  ;;  %v3300_v44 = vpop.eup %3299 }
 0x49e   : > { %3301 = vtanh.f32 %v1632_v33 }
 0x49f   : > { %v1552_v41 = vpop.f32.mrf.mxu0 }
 0x4a3   : > { %v1634_v61 = vpop.f32.mrf.mxu3 }
 0x4a4   : > { %v3302_v58 = vpop.eup %3301  ;;  %v1806_v5 = vpop.f32.mrf.mxu1  ;;  %v1635_v3 = vadd.f32 %v1634_v61, %v1546_v38  ;;  %v1553_v38 = vadd.f32 %v3920_v15, %v1552_v41  ;;  %v1865_v15 = vpack.c.bf16 %v1803_v4, %v1801_v0  ;;  %v4419_v41 = vpack.c.bf16 %v3980_v23, %v3975_v51 }
 0x4a5   : > { %v1689_v50 = vpack.c.bf16 %v3302_v58, %v3300_v44 }
 0x4a6   : > { %3303 = vtanh.f32 %v1635_v3 }
 0x4a7   : > { %3051 = vmatmul.msk.bf16.gmra.mxu1 %vm1308_vm1, %v1689_v50 }
 0x4ab   : > { %v1636_v63 = vpop.f32.mrf.mxu3 }
 0x4ac   : > { %v1637_v34 = vadd.f32 %v1636_v63, %v1548_v26  ;;  %v1808_v29 = vpop.f32.mrf.mxu1  ;;  %v3304_v14 = vpop.eup %3303 }
 0x4ae   : > { %3305 = vtanh.f32 %v1637_v34 }
 0x4b3   : > { %v1639_v20 = vpop.f32.mrf.mxu3 }
 0x4b4   : > { %v3306_v35 = vpop.eup %3305  ;;  %v1811_v33 = vpop.f32.mrf.mxu1  ;;  %v1640_v44 = vadd.f32 %v1639_v20, %v1551_v39  ;;  %v1866_v39 = vpack.c.bf16 %v1808_v29, %v1806_v5  ;;  %v4421_v5 = vpack.c.bf16 %v3962_v21, %v3957_v8 }
 0x4b5   : > { %v1690_v56 = vpack.c.bf16 %v3306_v35, %v3304_v14 }
 0x4b6   : > { %3307 = vtanh.f32 %v1640_v44 }
 0x4b7   : > { %3052 = vmatmul.msk.bf16.gmra.mxu1 %vm1308_vm1, %v1690_v56 }
 0x4bb   : > { %v1641_v22 = vpop.f32.mrf.mxu3 }
 0x4bc   : > { %v1642_v61 = vadd.f32 %v1641_v22, %v1553_v38  ;;  %v1813_v58 = vpop.f32.mrf.mxu1  ;;  %v3308_v50 = vpop.eup %3307 }
 0x4bd   : > { %v1867_v14 = vpack.c.bf16 %v1813_v58, %v1811_v33  ;;  %v4420_v33 = vpack.c.bf16 %v3971_v62, %v3966_v54 }
 0x4be   : > { %3309 = vtanh.f32 %v1642_v61 }
 0x4c4   : > { %v3310_v3 = vpop.eup %3309  ;;  %v1816_v26 = vpop.f32.mrf.mxu1 }
 0x4c5   : > { %v1691_v63 = vpack.c.bf16 %v3310_v3, %v3308_v50  ;;  %v2148_v50 = vld [vmem:[%s570_s30 + $0x8] sm:$0xff]  ;;  %v2165_v3 = vld [vmem:[%s4027_s22 + $0x20] sm:$0xff] }
 0x4c7   : > { %3053 = vmatmul.msk.bf16.gmra.mxu1 %vm1308_vm1, %v1691_v63  ;;  %v2166_v63 = vld [vmem:[%s4027_s22 + $0x28] sm:$0xff] }
 0x4cc   : > { %v1818_v34 = vpop.f32.mrf.mxu1 }
 0x4cd   : > { %v1868_v47 = vpack.c.bf16 %v1818_v34, %v1816_v26  ;;  %v2163_v26 = vld [vmem:[%s4027_s22 + $0x10] sm:$0xff] }
 0x4ce   : > { %v2167_v34 = vld [vmem:[%s4027_s22 + $0x30] sm:$0xff] }
 0x4cf   : > { %1881 = vmatpush.bf16.msra.mxu2 %v1868_v47  ;;  %v2170_v47 = vld [vmem:[%s4027_s22 + $0x48] sm:$0xff] }
 0x4d3   : > { %1882 = vmatpush.bf16.msra.mxu2 %v1867_v14 }
 0x4d4   : > { %v1821_v56 = vpop.f32.mrf.mxu1 }
 0x4d7   : > { %1883 = vmatpush.bf16.msra.mxu2 %v1866_v39  ;;  %v2173_v39 = vld [vmem:[%s4027_s22 + $0x60] sm:$0xff] }
 0x4db   : > { %1884 = vmatpush.bf16.msra.mxu2 %v1865_v15  ;;  %v2177_v15 = vld [vmem:[%s4027_s22 + $0x80] sm:$0xff] }
 0x4dc   : > { %v1823_v20 = vpop.f32.mrf.mxu1 }
 0x4dd   : > { %v1869_v35 = vpack.c.bf16 %v1823_v20, %v1821_v56 }
 0x4df   : > { %1885 = vmatpush.bf16.msra.mxu2 %v1864_v9 }
 0x4e3   : > { %1886 = vmatpush.bf16.msra.mxu2 %v4419_v41 }
 0x4e4   : > { %v1826_v44 = vpop.f32.mrf.mxu1 }
 0x4e7   : > { %1887 = vmatpush.bf16.msra.mxu2 %v4420_v33  ;;  %v2176_v33 = vld [vmem:[%s4027_s22 + $0x78] sm:$0xff] }
 0x4eb   : > { %1888 = vmatpush.bf16.msra.mxu2 %v4421_v5 }
 0x4ec   : > { %v1828_v0 = vpop.f32.mrf.mxu1 }
 0x4ed   : > { %v1870_v4 = vpack.c.bf16 %v1828_v0, %v1826_v44 }
 0x4ee   : > { %1889 = vmatmul.bf16.vlgmr.msra.gmra.mxu2 %v3625_v57 }
 0x4f4   : > { %v1831_v29 = vpop.f32.mrf.mxu1 }
 0x4fc   : > { %v1833_v32 = vpop.f32.mrf.mxu1 }
 0x4fd   : > { %v1871_v55 = vpack.c.bf16 %v1833_v32, %v1831_v29 }
 0x4fe   : > { %1894 = vmatmul.bf16.gmra.mxu2 %v3630_v2 }
 0x504   : > { %v1836_v51 = vpop.f32.mrf.mxu1 }
 0x50c   : > { %v1838_v23 = vpop.f32.mrf.mxu1 }
 0x50d   : > { %v1872_v9 = vpack.c.bf16 %v1838_v23, %v1836_v51  ;;  %v2180_v51 = vld [vmem:[%s4027_s22 + $0x98] sm:$0xff] }
 0x50e   : > { %1899 = vmatmul.bf16.gmra.mxu2 %v3640_v13 }
 0x514   : > { %v1841_v54 = vpop.f32.mrf.mxu1 }
 0x51c   : > { %v1843_v62 = vpop.f32.mrf.mxu1 }
 0x51e   : > { %1904 = vmatmul.bf16.gmra.mxu2 %v3650_v19  ;;  %v1873_v19 = vpack.c.bf16 %v1843_v62, %v1841_v54 }
 0x524   : > { %v1846_v8 = vpop.f32.mrf.mxu1 }
 0x52c   : > { %v1848_v21 = vpop.f32.mrf.mxu1 }
 0x52d   : > { %v1874_v58 = vpack.c.bf16 %v1848_v21, %v1846_v8 }
 0x52e   : > { %1909 = vmatmul.bf16.gmra.mxu2 %v3660_v25  ;;  %v2161_v25 = vld [vmem:[%s4027_s22] sm:$0xff] }
 0x534   : > { %v1851_v57 = vpop.f32.mrf.mxu1 }
 0x53c   : > { %v1853_v38 = vpop.f32.mrf.mxu1 }
 0x53d   : > { %v1875_v13 = vpack.c.bf16 %v1853_v38, %v1851_v57 }
 0x53e   : > { %1914 = vmatmul.bf16.gmra.mxu2 %v3670_v31  ;;  %v3439_v31 = vmov 0  }
 0x53f   : > { %3176 = vset.pattern.permute.xlu1 %v3439_v31  ;;  %3175 = vset.pattern.permute.xlu0 %v3439_v31 }
 0x540   : > { %2195 = vperm.xlu1 %3176, %v2161_v25   ;;  %3177 = vset.pattern.permute.xlu2 %v3439_v31 }
 0x541   : > { %2205 = vperm.xlu2 %3177, %v2163_v26  }
 0x544   : > { %v1856_v2 = vpop.f32.mrf.mxu1 }
 0x54c   : > { %v1858_v22 = vpop.f32.mrf.mxu1 }
 0x54d   : > { %v1876_v61 = vpack.c.bf16 %v1858_v22, %v1856_v2 }
 0x54e   : > { %1919 = vmatmul.bf16.gmra.mxu2 %v3680_v37  ;;  %v2162_v37 = vld [vmem:[%s4027_s22 + $0x8] sm:$0xff] }
 0x54f   : > { %1970 = vmatpush.bf16.msra.mxu0 %v1876_v61  ;;  %2200 = vperm.xlu1 %3176, %v2162_v37   ;;  %v2181_v61 = vld [vmem:[%s4027_s22 + $0xa0] sm:$0xff] }
 0x553   : > { %1971 = vmatpush.bf16.msra.mxu0 %v1875_v13 }
 0x557   : > { %1972 = vmatpush.bf16.msra.mxu0 %v1874_v58  ;;  %2220 = vperm.xlu1 %3176, %v2166_v63  }
 0x55b   : > { %1973 = vmatpush.bf16.msra.mxu0 %v1873_v19 }
 0x55e   : > { %1924 = vmatmul.bf16.gmra.mxu2 %v3690_v43  ;;  %v2147_v43 = vld [vmem:[%s570_s30] sm:$0xff]  ;;  %s537_s30 = sand.u32 1, %s3429_s16  }
 0x55f   : > { %1974 = vmatpush.bf16.msra.mxu0 %v1872_v9  ;;  %2151 = vperm.xlu0 %3175, %v2147_v43   ;;  %s2763_s19 = sshll.u32 %s537_s30, 4 }
 0x560   : > { %s539_s29 = scalar_lea.vmem [#allocation3], %s2763_s19  ;;  %s2605_s19 = scalar_lea.sflag [#allocation4], %s537_s30 }
 0x563   : > { %1975 = vmatpush.bf16.msra.mxu0 %v1871_v55 }
 0x567   : > { %1976 = vmatpush.bf16.msra.mxu0 %v1870_v4  ;;  %2156 = vperm.xlu0 %3175, %v2148_v50  }
 0x56b   : > { %1977 = vmatpush.bf16.msra.mxu0 %v1869_v35  ;;  %v2178_v35 = vld [vmem:[%s4027_s22 + $0x88] sm:$0xff] }
 0x56e   : > { %1978 = vmatmul.bf16.vlgmr.msra.gmra.mxu0 %v3638_v12  ;;  %1929 = vmatmul.bf16.gmra.mxu2 %v3700_v49  ;;  %v2164_v12 = vld [vmem:[%s4027_s22 + $0x18] sm:$0xff] }
 0x56f   : > { %2215 = vperm.xlu0 %3175, %v2165_v3   ;;  %v2168_v49 = vld [vmem:[%s4027_s22 + $0x38] sm:$0xff]  ;;  %2210 = vperm.xlu2 %3177, %v2164_v12   ;;  %v2179_v3 = vld [vmem:[%s4027_s22 + $0x90] sm:$0xff] }
 0x577   : > { %2230 = vperm.xlu0 %3175, %v2168_v49   ;;  %2225 = vperm.xlu2 %3177, %v2167_v34  }
 0x57e   : > { %1983 = vmatmul.bf16.gmra.mxu0 %v3648_v18  ;;  %1934 = vmatmul.bf16.gmra.mxu2 %v3716_v60  ;;  %v2169_v18 = vld [vmem:[%s4027_s22 + $0x40] sm:$0xff]  ;;  %v2172_v60 = vld [vmem:[%s4027_s22 + $0x58] sm:$0xff] }
 0x57f   : > { %2235 = vperm.xlu1 %3176, %v2169_v18   ;;  %2240 = vperm.xlu2 %3177, %v2170_v47  }
 0x587   : > { %2250 = vperm.xlu1 %3176, %v2172_v60   ;;  %2255 = vperm.xlu2 %3177, %v2173_v39  }
 0x58e   : > { %1988 = vmatmul.bf16.gmra.mxu0 %v3658_v24  ;;  %1939 = vmatmul.bf16.gmra.mxu2 %v3732_v7  ;;  %v2171_v24 = vld [vmem:[%s4027_s22 + $0x50] sm:$0xff]  ;;  %v1890_v7 = vpop.f32.mrf.mxu2 }
 0x58f   : > { %2245 = vperm.xlu0 %3175, %v2171_v24   ;;  %2270 = vperm.xlu2 %3177, %v2176_v33  }
 0x596   : > { %v1892_v14 = vpop.f32.mrf.mxu2 }
 0x597   : > { %2285 = vperm.xlu2 %3177, %v2179_v3  }
 0x59b   : > { %v2206_v2 = vpop.permute.xlu2 %2205 }
 0x59e   : > { %1993 = vmatmul.bf16.gmra.mxu0 %v3668_v30  ;;  %1944 = vmatmul.bf16.gmra.mxu2 %v3749_v28  ;;  %v2174_v30 = vld [vmem:[%s4027_s22 + $0x68] sm:$0xff]  ;;  %v2175_v28 = vld [vmem:[%s4027_s22 + $0x70] sm:$0xff] }
 0x59f   : > { %2260 = vperm.xlu0 %3175, %v2174_v30   ;;  %2265 = vperm.xlu1 %3176, %v2175_v28  }
 0x5a7   : > { %2275 = vperm.xlu0 %3175, %v2177_v15   ;;  %2280 = vperm.xlu1 %3176, %v2178_v35  }
 0x5ae   : > { %1998 = vmatmul.bf16.gmra.mxu0 %v3678_v36  ;;  %1949 = vmatmul.bf16.gmra.mxu2 %v3762_v53  ;;  %v1895_v36 = vpop.f32.mrf.mxu2  ;;  %v4070_v53 = vld [vmem:[%s4396_s7] ss:$0 sm:$0xff] }
 0x5af   : > { %v1893_v5 = vadd.f32 %v4070_v53, %v1892_v14  ;;  %v1896_v32 = vadd.f32 %v4070_v53, %v1895_v36  ;;  %2290 = vperm.xlu0 %3175, %v2180_v51   ;;  %2295 = vperm.xlu1 %3176, %v2181_v61   ;;  %v2183_v36 = vld [vmem:[%s4027_s22 + $0xb0] sm:$0xff] }
 0x5b2   : > { %v2196_v41 = vpop.permute.xlu1 %2195 }
 0x5b6   : > { %v1897_v56 = vpop.f32.mrf.mxu2 }
 0x5b7   : > { %v1898_v13 = vadd.f32 %v4070_v53, %v1897_v56  ;;  %2305 = vperm.xlu0 %3175, %v2183_v36  }
 0x5be   : > { %2003 = vmatmul.bf16.gmra.mxu0 %v3688_v42  ;;  %1954 = vmatmul.bf16.gmra.mxu2 %v3775_v17  ;;  %v1900_v42 = vpop.f32.mrf.mxu2 }
 0x5bf   : > { %v1901_v37 = vadd.f32 %v4070_v53, %v1900_v42 }
 0x5c6   : > { %v4073_v20 = vpop.f32.mrf.mxu2 }
 0x5c7   : > { %v1903_v28 = vadd.f32 %v4070_v53, %v4073_v20 }
 0x5c9   : > { %v2211_v26 = vpop.permute.xlu2 %2210 }
 0x5ce   : > { %2008 = vmatmul.bf16.gmra.mxu0 %v3698_v48  ;;  %v1891_v48 = vadd.f32 %v4070_v53, %v1890_v7  ;;  %1959 = vmatmul.bf16.gmra.mxu2 %v3788_v46  ;;  %v4078_v44 = vpop.f32.mrf.mxu2 }
 0x5d1   : > { %v4096_v21 = vpop.permute.xlu0 %2151 }
 0x5d6   : > { %v4086_v55 = vpop.f32.mrf.mxu2 }
 0x5d9   : > { %v4108_v43 = vpop.permute.xlu0 %2156 }
 0x5de   : > { %2013 = vmatmul.bf16.gmra.mxu0 %v3714_v59  ;;  %1964 = vmatmul.bf16.gmra.mxu2 %v3801_v11  ;;  %v4100_v22 = vpop.f32.mrf.mxu2 }
 0x5e1   : > { %v2216_v39 = vpop.permute.xlu0 %2215 }
 0x5e6   : > { %v4110_v50 = vpop.f32.mrf.mxu2 }
 0x5eb   : > { %v1979_v17 = vpop.f32.mrf.mxu0 }
 0x5ec   : > { %v1980_v59 = vadd.f32 %v1979_v17, %v1891_v48 }
 0x5ee   : > { %3311 = vtanh.f32 %v1980_v59  ;;  %2018 = vmatmul.bf16.gmra.mxu0 %v3730_v6  ;;  %v2201_v6 = vpop.permute.xlu1 %2200  ;;  %v4121_v14 = vpop.f32.mrf.mxu2 }
 0x5f3   : > { %v1981_v0 = vpop.f32.mrf.mxu0 }
 0x5f4   : > { %v4082_v4 = vpop.eup %3311  ;;  %v1982_v29 = vadd.f32 %v1981_v0, %v1893_v5  ;;  %v1906_v5 = vadd.f32 %v4070_v53, %v4078_v44  ;;  %v2184_v0 = vld [vmem:[%s4027_s22 + $0xb8] sm:$0xff] }
 0x5f5   : > { %v2353_v46 = vadd.f32 %v4082_v4, %v2196_v41  ;;  %2310 = vperm.xlu1 %3176, %v2184_v0  }
 0x5f6   : > { %3313 = vtanh.f32 %v1982_v29  ;;  %v4131_v20 = vpop.f32.mrf.mxu2 }
 0x5f7   : > { %v2385_v57 = vsel %vm1308_vm1, %v2353_v46, -inf  ;;  %v2221_v46 = vpop.permute.xlu1 %2220 }
 0x5fb   : > { %v1984_v23 = vpop.f32.mrf.mxu0 }
 0x5fc   : > { %v4090_v9 = vpop.eup %3313  ;;  %v1985_v54 = vadd.f32 %v1984_v23, %v1896_v32 }
 0x5fd   : > { %v2354_v62 = vadd.f32 %v4090_v9, %v2201_v6  ;;  %v2093_v8 = vpack.c.bf16 %v4090_v9, %v4082_v4 }
 0x5fe   : > { %3315 = vtanh.f32 %v1985_v54  ;;  %2023 = vmatmul.bf16.gmra.mxu0 %v3747_v27  ;;  %v4143_v61 = vpop.f32.mrf.mxu2 }
 0x5ff   : > { %v2386_v11 = vsel %vm1308_vm1, %v2354_v62, -inf }
 0x600   : > { %v2387_v38 = vmax.f32 %v2385_v57, %v2386_v11 }
 0x602   : > { %v2388_v31 = vrot.slane %v2387_v38, 4 }
 0x603   : > { %v1986_v58 = vpop.f32.mrf.mxu0 }
 0x604   : > { %v4104_v19 = vpop.eup %3315  ;;  %v1987_v25 = vadd.f32 %v1986_v58, %v1898_v13  ;;  %v2389_v49 = vmax.f32 %v2387_v38, %v2388_v31  ;;  %v2182_v13 = vld [vmem:[%s4027_s22 + $0xa8] sm:$0xff]  ;;  %v1908_v58 = vadd.f32 %v4070_v53, %v4086_v55 }
 0x605   : > { %v2355_v27 = vadd.f32 %v4104_v19, %v2206_v2  ;;  %2300 = vperm.xlu2 %3177, %v2182_v13  }
 0x606   : > { %3317 = vtanh.f32 %v1987_v25  ;;  %v2390_v47 = vrot.slane %v2389_v49, 2 }
 0x607   : > { %v2394_v60 = vsel %vm1308_vm1, %v2355_v27, -inf  ;;  %v2226_v27 = vpop.permute.xlu2 %2225 }
 0x60b   : > { %v1989_v63 = vpop.f32.mrf.mxu0 }
 0x60c   : > { %v4113_v12 = vpop.eup %3317  ;;  %v1990_v18 = vadd.f32 %v1989_v63, %v1901_v37 }
 0x60d   : > { %v2356_v34 = vadd.f32 %v4113_v12, %v2211_v26  ;;  %v2094_v24 = vpack.c.bf16 %v4113_v12, %v4104_v19 }
 0x60e   : > { %3319 = vtanh.f32 %v1990_v18  ;;  %2028 = vmatmul.bf16.gmra.mxu0 %v3760_v52  ;;  %v2391_v52 = vmax.f32 %v2389_v49, %v2390_v47  ;;  %v1911_v18 = vadd.f32 %v4070_v53, %v4100_v22  ;;  %v4154_v47 = vpop.f32.mrf.mxu2 }
 0x60f   : > { %v2395_v7 = vsel %vm1308_vm1, %v2356_v34, -inf  ;;  %v2186_v34 = vld [vmem:[%s4027_s22 + $0xc8] sm:$0xff] }
 0x610   : > { %v2396_v30 = vmax.f32 %v2394_v60, %v2395_v7  ;;  %v2392_v41 = vrot.slane %v2391_v52, 1  ;;  %v2231_v7 = vpop.permute.xlu0 %2230  ;;  %2320 = vperm.xlu0 %3175, %v2186_v34  }
 0x612   : > { %v2397_v56 = vrot.slane %v2396_v30, 4  ;;  %v2393_v6 = vmax.f32 %v2391_v52, %v2392_v41  ;;  %v2236_v41 = vpop.permute.xlu1 %2235 }
 0x613   : > { %v1991_v42 = vpop.f32.mrf.mxu0 }
 0x614   : > { %v4126_v15 = vpop.eup %3319  ;;  %v2398_v48 = vmax.f32 %v2396_v30, %v2397_v56  ;;  %v1992_v35 = vadd.f32 %v1991_v42, %v1903_v28 }
 0x615   : > { %v2357_v17 = vadd.f32 %v4126_v15, %v2216_v39 }
 0x616   : > { %v2399_v59 = vrot.slane %v2398_v48, 2  ;;  %3321 = vtanh.f32 %v1992_v35  ;;  %v2187_v35 = vld [vmem:[%s4027_s22 + $0xd0] sm:$0xff] }
 0x617   : > { %v2403_v11 = vsel %vm1308_vm1, %v2357_v17, -inf  ;;  %v1913_v17 = vadd.f32 %v4070_v53, %v4110_v50  ;;  %2325 = vperm.xlu1 %3176, %v2187_v35  }
 0x618   : > { %v2400_v33 = vmax.f32 %v2398_v48, %v2399_v59 }
 0x61a   : > { %v2401_v29 = vrot.slane %v2400_v33, 1 }
 0x61b   : > { %v1994_v32 = vpop.f32.mrf.mxu0 }
 0x61c   : > { %v4134_v51 = vpop.eup %3321  ;;  %v2402_v23 = vmax.f32 %v2400_v33, %v2401_v29  ;;  %v1995_v54 = vadd.f32 %v1994_v32, %v1906_v5 }
 0x61d   : > { %v2358_v62 = vadd.f32 %v4134_v51, %v2221_v46  ;;  %v2095_v57 = vpack.c.bf16 %v4134_v51, %v4126_v15  ;;  %v4171_v46 = vpop.f32.mrf.mxu2 }
 0x61e   : > { %v2546_v44 = vsel %vm2545_vm2, %v2402_v23, %v2393_v6  ;;  %3323 = vtanh.f32 %v1995_v54  ;;  %2033 = vmatmul.bf16.gmra.mxu0 %v3773_v16  ;;  %v1916_v23 = vadd.f32 %v4070_v53, %v4121_v14  ;;  %v2185_v54 = vld [vmem:[%s4027_s22 + $0xc0] sm:$0xff] }
 0x61f   : > { %v2404_v38 = vsel %vm1308_vm1, %v2358_v62, -inf  ;;  %v2241_v62 = vpop.permute.xlu2 %2240  ;;  %2315 = vperm.xlu2 %3177, %v2185_v54  }
 0x620   : > { %v2405_v2 = vmax.f32 %v2403_v11, %v2404_v38 }
 0x622   : > { %v2406_v25 = vrot.slane %v2405_v2, 4 }
 0x623   : > { %v1996_v31 = vpop.f32.mrf.mxu0 }
 0x624   : > { %v4148_v37 = vpop.eup %3323  ;;  %v2407_v3 = vmax.f32 %v2405_v2, %v2406_v25  ;;  %v1997_v16 = vadd.f32 %v1996_v31, %v1908_v58 }
 0x625   : > { %v2359_v26 = vadd.f32 %v4148_v37, %v2226_v27  ;;  %v4183_v27 = vpop.f32.mrf.mxu2 }
 0x626   : > { %v2408_v63 = vrot.slane %v2407_v3, 2  ;;  %3325 = vtanh.f32 %v1997_v16  ;;  %v1918_v16 = vadd.f32 %v4070_v53, %v4131_v20  ;;  %v1921_v20 = vadd.f32 %v4070_v53, %v4143_v61 }
 0x627   : > { %v2412_v42 = vsel %vm1308_vm1, %v2359_v26, -inf }
 0x628   : > { %v2409_v49 = vmax.f32 %v2407_v3, %v2408_v63  ;;  %v2189_v3 = vld [vmem:[%s4027_s22 + $0xe0] sm:$0xff]  ;;  %v2246_v63 = vpop.permute.xlu0 %2245 }
 0x629   : > { %2335 = vperm.xlu0 %3175, %v2189_v3  }
 0x62a   : > { %v2410_v60 = vrot.slane %v2409_v49, 1 }
 0x62b   : > { %v1999_v55 = vpop.f32.mrf.mxu0 }
 0x62c   : > { %v4156_v30 = vpop.eup %3325  ;;  %v2411_v36 = vmax.f32 %v2409_v49, %v2410_v60  ;;  %v2000_v28 = vadd.f32 %v1999_v55, %v1911_v18 }
 0x62d   : > { %v2360_v56 = vadd.f32 %v4156_v30, %v2231_v7  ;;  %v2096_v39 = vpack.c.bf16 %v4156_v30, %v4148_v37  ;;  %v3056_v37 = vld [vmem:[%s4248_s26] sm:$0xf]  ;;  %v3127_v30 = vld [vmem:[%s4248_s26 + $0x4] sm:$0xf0] }
 0x62e   : > { %v2548_v22 = vsel %vm2547_vm3, %v2411_v36, %v2546_v44  ;;  %3327 = vtanh.f32 %v2000_v28  ;;  %2038 = vmatmul.bf16.gmra.mxu0 %v3786_v45  ;;  %v1930_v36 = vpop.f32.mrf.mxu2  ;;  %v2190_v28 = vld [vmem:[%s4027_s22 + $0xe8] sm:$0xff] }
 0x62f   : > { %v2413_v52 = vsel %vm1308_vm1, %v2360_v56, -inf  ;;  %2340 = vperm.xlu1 %3176, %v2190_v28  }
 0x630   : > { %v2414_v48 = vmax.f32 %v2412_v42, %v2413_v52 }
 0x632   : > { %v2415_v59 = vrot.slane %v2414_v48, 4 }
 0x633   : > { %v2001_v33 = vpop.f32.mrf.mxu0 }
 0x634   : > { %v4168_v5 = vpop.eup %3327  ;;  %v2416_v0 = vmax.f32 %v2414_v48, %v2415_v59  ;;  %v2002_v29 = vadd.f32 %v2001_v33, %v1913_v17 }
 0x635   : > { %v2361_v45 = vadd.f32 %v4168_v5, %v2236_v41 }
 0x636   : > { %v2417_v32 = vrot.slane %v2416_v0, 2  ;;  %3329 = vtanh.f32 %v2002_v29  ;;  %v1923_v29 = vadd.f32 %v4070_v53, %v4154_v47 }
 0x637   : > { %v2421_v14 = vsel %vm1308_vm1, %v2361_v45, -inf }
 0x638   : > { %v2418_v6 = vmax.f32 %v2416_v0, %v2417_v32  ;;  %v2188_v0 = vld [vmem:[%s4027_s22 + $0xd8] sm:$0xff] }
 0x639   : > { %2330 = vperm.xlu2 %3177, %v2188_v0  }
 0x63a   : > { %v2419_v50 = vrot.slane %v2418_v6, 1 }
 0x63b   : > { %v2004_v44 = vpop.f32.mrf.mxu0 }
 0x63c   : > { %v4176_v11 = vpop.eup %3329  ;;  %v2420_v38 = vmax.f32 %v2418_v6, %v2419_v50  ;;  %v2005_v2 = vadd.f32 %v2004_v44, %v1916_v23  ;;  %v1932_v6 = vpop.f32.mrf.mxu2 }
 0x63d   : > { %v2362_v13 = vadd.f32 %v4176_v11, %v2241_v62  ;;  %v2256_v44 = vpop.permute.xlu2 %2255 }
 0x63e   : > { %3331 = vtanh.f32 %v2005_v2  ;;  %2043 = vmatmul.bf16.gmra.mxu0 %v3799_v10  ;;  %v2550_v58 = vsel %vm2549_vm4, %v2420_v38, %v2548_v22  ;;  %v2251_v22 = vpop.permute.xlu1 %2250  ;;  %v2192_v38 = vld [vmem:[%s4027_s22 + $0xf8] sm:$0xff] }
 0x63f   : > { %v2422_v25 = vsel %vm1308_vm1, %v2362_v13, -inf  ;;  %v1926_v13 = vadd.f32 %v4070_v53, %v4171_v46  ;;  %2350 = vperm.xlu0 %3175, %v2192_v38  }
 0x640   : > { %v2423_v31 = vmax.f32 %v2421_v14, %v2422_v25 }
 0x642   : > { %v2424_v26 = vrot.slane %v2423_v31, 4 }
 0x643   : > { %v2006_v49 = vpop.f32.mrf.mxu0 }
 0x644   : > { %v4188_v18 = vpop.eup %3331  ;;  %v2425_v10 = vmax.f32 %v2423_v31, %v2424_v26  ;;  %v2007_v34 = vadd.f32 %v2006_v49, %v1918_v16  ;;  %v1935_v16 = vpop.f32.mrf.mxu2 }
 0x645   : > { %v2363_v60 = vadd.f32 %v4188_v18, %v2246_v63 }
 0x646   : > { %v2426_v7 = vrot.slane %v2425_v10, 2  ;;  %3333 = vtanh.f32 %v2007_v34  ;;  %v1928_v34 = vadd.f32 %v4070_v53, %v4183_v27 }
 0x647   : > { %v2430_v41 = vsel %vm1308_vm1, %v2363_v60, -inf }
 0x648   : > { %v2427_v55 = vmax.f32 %v2425_v10, %v2426_v7 }
 0x64a   : > { %v2428_v56 = vrot.slane %v2427_v55, 1 }
 0x64b   : > { %v2009_v42 = vpop.f32.mrf.mxu0 }
 0x64c   : > { %v4194_v52 = vpop.eup %3333  ;;  %v2429_v48 = vmax.f32 %v2427_v55, %v2428_v56  ;;  %v2010_v17 = vadd.f32 %v2009_v42, %v1921_v20  ;;  %v1937_v20 = vpop.f32.mrf.mxu2  ;;  %v1931_v42 = vadd.f32 %v4070_v53, %v1930_v36 }
 0x64d   : > { %v2364_v35 = vadd.f32 %v4194_v52, %v2251_v22 }
 0x64e   : > { %2048 = vmatmul.bf16.gmra.mxu0 %v3810_v40  ;;  %v2552_v59 = vsel %vm2551_vm5, %v2429_v48, %v2550_v58  ;;  %3335 = vtanh.f32 %v2010_v17  ;;  %v2261_v58 = vpop.permute.xlu0 %2260  ;;  %v2266_v48 = vpop.permute.xlu1 %2265 }
 0x64f   : > { %v2431_v33 = vsel %vm1308_vm1, %v2364_v35, -inf  ;;  %v2191_v35 = vld [vmem:[%s4027_s22 + $0xf0] sm:$0xff] }
 0x650   : > { %v2432_v61 = vmax.f32 %v2430_v41, %v2431_v33  ;;  %2345 = vperm.xlu2 %3177, %v2191_v35  }
 0x652   : > { %v2433_v45 = vrot.slane %v2432_v61, 4 }
 0x653   : > { %v2011_v32 = vpop.f32.mrf.mxu0 }
 0x654   : > { %v2434_v23 = vmax.f32 %v2432_v61, %v2433_v45  ;;  %v2012_v54 = vadd.f32 %v2011_v32, %v1923_v29  ;;  %v3336_v50 = vpop.eup %3335 }
 0x655   : > { %v2365_v47 = vadd.f32 %v3336_v50, %v2256_v44  ;;  %v1933_v44 = vadd.f32 %v4070_v53, %v1932_v6  ;;  %v2097_v6 = vpack.c.bf16 %v4176_v11, %v4168_v5 }
 0x656   : > { %v2435_v40 = vrot.slane %v2434_v23, 2  ;;  %3337 = vtanh.f32 %v2012_v54 }
 0x657   : > { %v2439_v49 = vsel %vm1308_vm1, %v2365_v47, -inf  ;;  %v2098_v47 = vpack.c.bf16 %v4194_v52, %v4188_v18 }
 0x658   : > { %v2436_v62 = vmax.f32 %v2434_v23, %v2435_v40 }
 0x65a   : > { %v2437_v2 = vrot.slane %v2436_v62, 1 }
 0x65b   : > { %v2014_v14 = vpop.f32.mrf.mxu0 }
 0x65c   : > { %v3338_v25 = vpop.eup %3337  ;;  %v2438_v31 = vmax.f32 %v2436_v62, %v2437_v2  ;;  %v2015_v26 = vadd.f32 %v2014_v14, %v1926_v13  ;;  %v1940_v62 = vpop.f32.mrf.mxu2 }
 0x65d   : > { %v2366_v3 = vadd.f32 %v3338_v25, %v2261_v58  ;;  %v2099_v40 = vpack.c.bf16 %v3338_v25, %v3336_v50  ;;  %v1936_v50 = vadd.f32 %v4070_v53, %v1935_v16  ;;  %v2276_v25 = vpop.permute.xlu0 %2275  ;;  %v1941_v51 = vadd.f32 %v4070_v53, %v1940_v62 }
 0x65e   : > { %2053 = vmatmul.bf16.gmra.mxu0 %v3818_v1  ;;  %v2554_v63 = vsel %vm2553_vm6, %v2438_v31, %v2552_v59  ;;  %3339 = vtanh.f32 %v2015_v26  ;;  %v2271_v59 = vpop.permute.xlu2 %2270 }
 0x65f   : > { %v2440_v10 = vsel %vm1308_vm1, %v2366_v3, -inf }
 0x660   : > { %v2441_v46 = vmax.f32 %v2439_v49, %v2440_v10 }
 0x662   : > { %v2442_v60 = vrot.slane %v2441_v46, 4 }
 0x663   : > { %v2016_v7 = vpop.f32.mrf.mxu0 }
 0x664   : > { %v2443_v55 = vmax.f32 %v2441_v46, %v2442_v60  ;;  %v2017_v28 = vadd.f32 %v2016_v7, %v1928_v34  ;;  %v3340_v1 = vpop.eup %3339  ;;  %v1942_v46 = vpop.f32.mrf.mxu2 }
 0x665   : > { %v2367_v41 = vadd.f32 %v3340_v1, %v2266_v48  ;;  %v1943_v4 = vadd.f32 %v4070_v53, %v1942_v46 }
 0x666   : > { %v2444_v56 = vrot.slane %v2443_v55, 2  ;;  %3341 = vtanh.f32 %v2017_v28  ;;  %v1938_v28 = vadd.f32 %v4070_v53, %v1937_v20  ;;  %v3057_v20 = vor.u32 %v3127_v30, %v3056_v37 }
 0x667   : > { %v2448_v23 = vsel %vm1308_vm1, %v2367_v41, -inf }
 0x668   : > { %v2445_v22 = vmax.f32 %v2443_v55, %v2444_v56 }
 0x66a   : > { %v2446_v17 = vrot.slane %v2445_v22, 1 }
 0x66b   : > { %v2019_v33 = vpop.f32.mrf.mxu0 }
 0x66c   : > { %v3342_v27 = vpop.eup %3341  ;;  %v2447_v61 = vmax.f32 %v2445_v22, %v2446_v17  ;;  %v2020_v0 = vadd.f32 %v2019_v33, %v1931_v42  ;;  %v1945_v22 = vpop.f32.mrf.mxu2 }
 0x66d   : > { %v2368_v29 = vadd.f32 %v3342_v27, %v2271_v59  ;;  %v2100_v45 = vpack.c.bf16 %v3342_v27, %v3340_v1  ;;  %v2291_v42 = vpop.permute.xlu0 %2290  ;;  %v1946_v62 = vadd.f32 %v4070_v53, %v1945_v22 }
 0x66e   : > { %v2556_v32 = vsel %vm2555_vm7, %v2447_v61, %v2554_v63  ;;  %3343 = vtanh.f32 %v2020_v0  ;;  %v2281_v63 = vpop.permute.xlu1 %2280 }
 0x66f   : > { %v2449_v54 = vsel %vm1308_vm1, %v2368_v29, -inf  ;;  %2119 = vmatpush.bf16.msrb.mxu0 %v2100_v45 }
 0x670   : > { %v2450_v36 = vmax.f32 %v2448_v23, %v2449_v54 }
 0x672   : > { %v2451_v38 = vrot.slane %v2450_v36, 4 }
 0x673   : > { %v2021_v2 = vpop.f32.mrf.mxu0  ;;  %2120 = vmatpush.bf16.msrb.mxu0 %v2099_v40 }
 0x674   : > { %v2452_v13 = vmax.f32 %v2450_v36, %v2451_v38  ;;  %v2022_v58 = vadd.f32 %v2021_v2, %v1933_v44  ;;  %v4221_v31 = vpop.eup %3343  ;;  %v1947_v27 = vpop.f32.mrf.mxu2 }
 0x675   : > { %v2369_v49 = vadd.f32 %v4221_v31, %v2276_v25  ;;  %v2306_v37 = vpop.permute.xlu0 %2305 }
 0x676   : > { %v2453_v14 = vrot.slane %v2452_v13, 2  ;;  %3345 = vtanh.f32 %v2022_v58  ;;  %v2296_v44 = vpop.permute.xlu1 %2295 }
 0x677   : > { %2121 = vmatpush.bf16.msrb.mxu0 %v2098_v47  ;;  %v2457_v11 = vsel %vm1308_vm1, %v2369_v49, -inf }
 0x678   : > { %v2454_v3 = vmax.f32 %v2452_v13, %v2453_v14 }
 0x67a   : > { %v2455_v26 = vrot.slane %v2454_v3, 1 }
 0x67b   : > { %v2024_v10 = vpop.f32.mrf.mxu0  ;;  %2122 = vmatpush.bf16.msrb.mxu0 %v2097_v6 }
 0x67c   : > { %v4227_v18 = vpop.eup %3345  ;;  %v2025_v52 = vadd.f32 %v2024_v10, %v1936_v50  ;;  %v2456_v34 = vmax.f32 %v2454_v3, %v2455_v26  ;;  %v1950_v38 = vpop.f32.mrf.mxu2 }
 0x67d   : > { %v2370_v60 = vadd.f32 %v4227_v18, %v2281_v63  ;;  %v2101_v16 = vpack.c.bf16 %v4227_v18, %v4221_v31  ;;  %v1951_v22 = vadd.f32 %v4070_v53, %v1950_v38  ;;  %v3181_v31 = vld [vmem:[%s4400_s11] ss:$0 sm:$0xff] }
 0x67e   : > { %v4233_v5 = vsel %vm2557_vm8, %v2456_v34, %v2556_v32  ;;  %3347 = vtanh.f32 %v2025_v52  ;;  %v1948_v52 = vadd.f32 %v4070_v53, %v1947_v27 }
 0x67f   : > { %v2458_v7 = vsel %vm1308_vm1, %v2370_v60, -inf  ;;  %2123 = vmatpush.bf16.msrb.mxu0 %v2096_v39 }
 0x680   : > { %v2459_v55 = vmax.f32 %v2457_v11, %v2458_v7 }
 0x682   : > { %v2460_v15 = vrot.slane %v2459_v55, 4 }
 0x683   : > { %v2026_v56 = vpop.f32.mrf.mxu0  ;;  %2124 = vmatpush.bf16.msrb.mxu0 %v2095_v57  ;;  %v2286_v57 = vpop.permute.xlu2 %2285 }
 0x684   : > { %v2027_v1 = vadd.f32 %v2026_v56, %v1938_v28  ;;  %v4255_v39 = vpop.eup %3347  ;;  %v2461_v59 = vmax.f32 %v2459_v55, %v2460_v15  ;;  %v1952_v11 = vpop.f32.mrf.mxu2 }
 0x685   : > { %v2371_v48 = vadd.f32 %v4255_v39, %v2286_v57  ;;  %v2311_v15 = vpop.permute.xlu1 %2310 }
 0x686   : > { %3349 = vtanh.f32 %v2027_v1  ;;  %v2462_v61 = vrot.slane %v2461_v59, 2 }
 0x687   : > { %2125 = vmatpush.bf16.msrb.mxu0 %v2094_v24  ;;  %v2466_v41 = vsel %vm1308_vm1, %v2371_v48, -inf }
 0x688   : > { %v2463_v29 = vmax.f32 %v2461_v59, %v2462_v61  ;;  %v1953_v61 = vadd.f32 %v4070_v53, %v1952_v11 }
 0x68a   : > { %v2464_v36 = vrot.slane %v2463_v29, 1 }
 0x68b   : > { %v2029_v35 = vpop.f32.mrf.mxu0  ;;  %2126 = vmatpush.bf16.msrb.mxu0 %v2093_v8  ;;  %v2301_v13 = vpop.permute.xlu2 %2300 }
 0x68c   : > { %v4262_v17 = vpop.eup %3349  ;;  %v2030_v19 = vadd.f32 %v2029_v35, %v1941_v51  ;;  %v2465_v3 = vmax.f32 %v2463_v29, %v2464_v36  ;;  %v1955_v59 = vpop.f32.mrf.mxu2 }
 0x68d   : > { %v2372_v12 = vadd.f32 %v4262_v17, %v2291_v42  ;;  %v2102_v24 = vpack.c.bf16 %v4262_v17, %v4255_v39 }
 0x68e   : > { %2127 = vmatmul.bf16.vlgmr.msrb.gmra.mxu0 %v3057_v20  ;;  %3351 = vtanh.f32 %v2030_v19 }
 0x68f   : > { %v2467_v33 = vsel %vm1308_vm1, %v2372_v12, -inf }
 0x690   : > { %v2468_v0 = vmax.f32 %v2466_v41, %v2467_v33 }
 0x692   : > { %v2469_v9 = vrot.slane %v2468_v0, 4 }
 0x693   : > { %v2031_v8 = vpop.f32.mrf.mxu0  ;;  %v2316_v36 = vpop.permute.xlu2 %2315 }
 0x694   : > { %v2470_v45 = vmax.f32 %v2468_v0, %v2469_v9  ;;  %v2032_v32 = vadd.f32 %v2031_v8, %v1943_v4  ;;  %v4270_v54 = vpop.eup %3351 }
 0x695   : > { %v2373_v58 = vadd.f32 %v4270_v54, %v2296_v44  ;;  %v2321_v44 = vpop.permute.xlu0 %2320 }
 0x696   : > { %v2471_v23 = vrot.slane %v2470_v45, 2  ;;  %3353 = vtanh.f32 %v2032_v32 }
 0x697   : > { %v2475_v49 = vsel %vm1308_vm1, %v2373_v58, -inf }
 0x698   : > { %v2472_v40 = vmax.f32 %v2470_v45, %v2471_v23  ;;  %v1957_v45 = vpop.f32.mrf.mxu2 }
 0x69a   : > { %v2473_v2 = vrot.slane %v2472_v40, 1 }
 0x69b   : > { %v2034_v47 = vpop.f32.mrf.mxu0 }
 0x69c   : > { %v4274_v14 = vpop.eup %3353  ;;  %v2474_v50 = vmax.f32 %v2472_v40, %v2473_v2  ;;  %v2035_v25 = vadd.f32 %v2034_v47, %v1946_v62  ;;  %v1956_v62 = vadd.f32 %v4070_v53, %v1955_v59 }
 0x69d   : > { %v2374_v6 = vadd.f32 %v4274_v14, %v2301_v13  ;;  %v2103_v26 = vpack.c.bf16 %v4274_v14, %v4270_v54 }
 0x69e   : > { %v2559_v63 = vsel %vm2545_vm2, %v2474_v50, %v2465_v3  ;;  %3355 = vtanh.f32 %v2035_v25 }
 0x69f   : > { %v2476_v10 = vsel %vm1308_vm1, %v2374_v6, -inf }
 0x6a0   : > { %v2477_v46 = vmax.f32 %v2475_v49, %v2476_v10  ;;  %v1960_v49 = vpop.f32.mrf.mxu2  ;;  %v1958_v10 = vadd.f32 %v4070_v53, %v1957_v45 }
 0x6a2   : > { %v2478_v34 = vrot.slane %v2477_v46, 4 }
 0x6a3   : > { %v2036_v60 = vpop.f32.mrf.mxu0 }
 0x6a4   : > { %v2479_v7 = vmax.f32 %v2477_v46, %v2478_v34  ;;  %v2037_v55 = vadd.f32 %v2036_v60, %v1948_v52  ;;  %v4283_v56 = vpop.eup %3355 }
 0x6a5   : > { %v2375_v51 = vadd.f32 %v4283_v56, %v2306_v37  ;;  %v2331_v37 = vpop.permute.xlu2 %2330 }
 0x6a6   : > { %v2480_v28 = vrot.slane %v2479_v7, 2  ;;  %3357 = vtanh.f32 %v2037_v55 }
 0x6a7   : > { %v2484_v41 = vsel %vm1308_vm1, %v2375_v51, -inf }
 0x6a8   : > { %v2481_v1 = vmax.f32 %v2479_v7, %v2480_v28  ;;  %v2326_v28 = vpop.permute.xlu1 %2325 }
 0x6aa   : > { %v2482_v30 = vrot.slane %v2481_v1, 1 }
 0x6ab   : > { %v2039_v57 = vpop.f32.mrf.mxu0 }
 0x6ac   : > { %v4287_v20 = vpop.eup %3357  ;;  %v2483_v42 = vmax.f32 %v2481_v1, %v2482_v30  ;;  %v2040_v48 = vadd.f32 %v2039_v57, %v1951_v22  ;;  %v1961_v22 = vadd.f32 %v4070_v53, %v1960_v49 }
 0x6ad   : > { %v2376_v35 = vadd.f32 %v4287_v20, %v2311_v15  ;;  %v2104_v19 = vpack.c.bf16 %v4287_v20, %v4283_v56  ;;  %v1962_v15 = vpop.f32.mrf.mxu2 }
 0x6ae   : > { %v2560_v12 = vsel %vm2547_vm3, %v2483_v42, %v2559_v63  ;;  %3359 = vtanh.f32 %v2040_v48 }
 0x6af   : > { %v2485_v33 = vsel %vm1308_vm1, %v2376_v35, -inf }
 0x6b0   : > { %v2486_v27 = vmax.f32 %v2484_v41, %v2485_v33 }
 0x6b2   : > { %v2487_v0 = vrot.slane %v2486_v27, 4 }
 0x6b3   : > { %v2041_v4 = vpop.f32.mrf.mxu0 }
 0x6b4   : > { %v2488_v9 = vmax.f32 %v2486_v27, %v2487_v0  ;;  %v2042_v8 = vadd.f32 %v2041_v4, %v1953_v61  ;;  %v4296_v32 = vpop.eup %3359  ;;  %v1963_v27 = vadd.f32 %v4070_v53, %v1962_v15 }
 0x6b5   : > { %v2377_v38 = vadd.f32 %v4296_v32, %v2316_v36  ;;  %v2336_v36 = vpop.permute.xlu0 %2335 }
 0x6b6   : > { %v2489_v29 = vrot.slane %v2488_v9, 2  ;;  %3361 = vtanh.f32 %v2042_v8  ;;  %v1965_v8 = vpop.f32.mrf.mxu2 }
 0x6b7   : > { %v2493_v25 = vsel %vm1308_vm1, %v2377_v38, -inf }
 0x6b8   : > { %v2490_v23 = vmax.f32 %v2488_v9, %v2489_v29 }
 0x6ba   : > { %v2491_v40 = vrot.slane %v2490_v23, 1 }
 0x6bb   : > { %v2044_v2 = vpop.f32.mrf.mxu0 }
 0x6bc   : > { %v4300_v13 = vpop.eup %3361  ;;  %v2492_v58 = vmax.f32 %v2490_v23, %v2491_v40  ;;  %v2045_v3 = vadd.f32 %v2044_v2, %v1956_v62  ;;  %v1966_v62 = vadd.f32 %v4070_v53, %v1965_v8 }
 0x6bd   : > { %v2378_v47 = vadd.f32 %v4300_v13, %v2321_v44  ;;  %v2341_v44 = vpop.permute.xlu1 %2340  ;;  %v2105_v8 = vpack.c.bf16 %v4300_v13, %v4296_v32 }
 0x6be   : > { %v2561_v50 = vsel %vm2549_vm4, %v2492_v58, %v2560_v12  ;;  %3363 = vtanh.f32 %v2045_v3 }
 0x6bf   : > { %v2494_v6 = vsel %vm1308_vm1, %v2378_v47, -inf }
 0x6c0   : > { %v2495_v63 = vmax.f32 %v2493_v25, %v2494_v6 }
 0x6c2   : > { %v2496_v46 = vrot.slane %v2495_v63, 4 }
 0x6c3   : > { %v2046_v52 = vpop.f32.mrf.mxu0 }
 0x6c4   : > { %v2497_v34 = vmax.f32 %v2495_v63, %v2496_v46  ;;  %v2047_v60 = vadd.f32 %v2046_v52, %v1958_v10  ;;  %v4307_v7 = vpop.eup %3363  ;;  %v1967_v63 = vpop.f32.mrf.mxu2 }
 0x6c5   : > { %v2379_v30 = vadd.f32 %v4307_v7, %v2326_v28  ;;  %v1968_v46 = vadd.f32 %v4070_v53, %v1967_v63 }
 0x6c6   : > { %v2498_v11 = vrot.slane %v2497_v34, 2  ;;  %3365 = vtanh.f32 %v2047_v60 }
 0x6c7   : > { %v2502_v12 = vsel %vm1308_vm1, %v2379_v30, -inf  ;;  %v2351_v30 = vpop.permute.xlu0 %2350 }
 0x6c8   : > { %v2499_v55 = vmax.f32 %v2497_v34, %v2498_v11 }
 0x6ca   : > { %v2500_v1 = vrot.slane %v2499_v55, 1 }
 0x6cb   : > { %v2049_v51 = vpop.f32.mrf.mxu0 }
 0x6cc   : > { %v4311_v57 = vpop.eup %3365  ;;  %v2501_v42 = vmax.f32 %v2499_v55, %v2500_v1  ;;  %v2050_v35 = vadd.f32 %v2049_v51, %v1961_v22  ;;  %v2346_v22 = vpop.permute.xlu2 %2345 }
 0x6cd   : > { %v2380_v48 = vadd.f32 %v4311_v57, %v2331_v37 }
 0x6ce   : > { %v2562_v59 = vsel %vm2551_vm5, %v2501_v42, %v2561_v50  ;;  %3367 = vtanh.f32 %v2050_v35 }
 0x6cf   : > { %v2503_v41 = vsel %vm1308_vm1, %v2380_v48, -inf }
 0x6d0   : > { %v2504_v33 = vmax.f32 %v2502_v12, %v2503_v41 }
 0x6d2   : > { %v2505_v61 = vrot.slane %v2504_v33, 4 }
 0x6d3   : > { %v2051_v0 = vpop.f32.mrf.mxu0 }
 0x6d4   : > { %v2506_v4 = vmax.f32 %v2504_v33, %v2505_v61  ;;  %v2052_v9 = vadd.f32 %v2051_v0, %v1963_v27  ;;  %v3368_v45 = vpop.eup %3367  ;;  %v2106_v0 = vpack.c.bf16 %v4311_v57, %v4307_v7  ;;  %v3126_v7 = vld [vmem:[%s4248_s26 + $0x4] sm:$0xf]  ;;  %v3058_v57 = vld [vmem:[%s4248_s26 + $0x8] sm:$0xf0]  ;;  %s3128_s26 = sshll.u32 %s3542_s12, 4 }
 0x6d5   : > { %v2381_v38 = vadd.f32 %v3368_v45, %v2336_v36  ;;  %v3061_v32 = vor.u32 %v3126_v7, %v3058_v57  ;;  %s2620_s2 = scalar_lea.hbm %s4403_s14, %s3128_s26 }
 0x6d6   : > { %v2507_v29 = vrot.slane %v2506_v4, 2  ;;  %3369 = vtanh.f32 %v2052_v9  ;;  %s2623_s3 = sshll.u32 %s2620_s2, 4  ;;  %s3395_s2 = scalar_lea.hbm %s4403_s14, 128  ;;  %s2624_s3 = int_to_ptr.hbm [resolvable:$true] %s2623_s3 }
 0x6d7   : > { %v2511_v6 = vsel %vm1308_vm1, %v2381_v38, -inf  ;;  %s3389_s21 = sshra.s32 %s2624_s3, 4  ;;  %s3390_s21 = int_to_ptr.hbm [resolvable:$true] %s3389_s21 }
 0x6d8   : > { %v2508_v23 = vmax.f32 %v2506_v4, %v2507_v29  ;;  %s3391_s22 = scalar_lea.hbm %s3390_s21, 16  ;;  %p3396_p1 = scmp.lt.s32.totalorder %s3390_s21, %s4403_s14 }
 0x6d9   : > { %p3392_p12 = scmp.ne.s32.totalorder %s3390_s21, %s3391_s22  ;;  %p3397_p2 = scmp.lt.s32.totalorder %s3395_s2, %s3391_s22 }
 0x6da   : > { %v2509_v40 = vrot.slane %v2508_v23, 1 }
 0x6db   : > { %v2054_v2 = vpop.f32.mrf.mxu0  ;;  %p3393_p13 = pnand %p3392_p12, %p3559_p5  ;;  %p3398_p3 = por %p3397_p2, %p3396_p1 }
 0x6dc   : > { %v3370_v58 = vpop.eup %3369  ;;  %v2510_v47 = vmax.f32 %v2508_v23, %v2509_v40  ;;  %v2055_v50 = vadd.f32 %v2054_v2, %v1966_v62 }
 0x6dd   : > { %v2382_v3 = vadd.f32 %v3370_v58, %v2341_v44  ;;  %v2107_v33 = vpack.c.bf16 %v3370_v58, %v3368_v45  ;;  %p3394_p0 = pneg %p3393_p13 }
 0x6de   : > { %v2563_v25 = vsel %vm2553_vm6, %v2510_v47, %v2562_v59  ;;  %3371 = vtanh.f32 %v2055_v50 }
 0x6df   : > { %v2512_v49 = vsel %vm1308_vm1, %v2382_v3, -inf  ;;  %p3399_p4 = pnand %p3398_p3, %p3394_p0 }
 0x6e0   : > { %v2513_v10 = vmax.f32 %v2511_v6, %v2512_v49 }
 0x6e2   : > { %v2514_v52 = vrot.slane %v2513_v10, 4 }
 0x6e3   : > { %v2056_v34 = vpop.f32.mrf.mxu0 }
 0x6e4   : > { %v2515_v60 = vmax.f32 %v2513_v10, %v2514_v52  ;;  %v2057_v11 = vadd.f32 %v2056_v34, %v1968_v46  ;;  %v3372_v28 = vpop.eup %3371 }
 0x6e5   : > { %v2383_v15 = vadd.f32 %v3372_v28, %v2346_v22 }
 0x6e6   : > { %v2516_v55 = vrot.slane %v2515_v60, 2  ;;  %3373 = vtanh.f32 %v2057_v11 }
 0x6e7   : > { %v2520_v53 = vsel %vm1308_vm1, %v2383_v15, -inf }
 0x6e8   : > { %v2517_v1 = vmax.f32 %v2515_v60, %v2516_v55 }
 0x6ea   : > { %v2518_v37 = vrot.slane %v2517_v1, 1 }
 0x6ec   : > { %v3374_v51 = vpop.eup %3373  ;;  %v2519_v42 = vmax.f32 %v2517_v1, %v2518_v37 }
 0x6ed   : > { %v2384_v48 = vadd.f32 %v3374_v51, %v2351_v30  ;;  %v2108_v35 = vpack.c.bf16 %v3374_v51, %v3372_v28 }
 0x6ee   : > { %v2564_v59 = vsel %vm2555_vm7, %v2519_v42, %v2563_v25 }
 0x6ef   : > { %v2521_v12 = vsel %vm1308_vm1, %v2384_v48, -inf  ;;  %2133 = vmatpush.bf16.msrb.mxu1 %v2108_v35 }
 0x6f0   : > { %v2522_v41 = vmax.f32 %v2520_v53, %v2521_v12 }
 0x6f2   : > { %v2523_v27 = vrot.slane %v2522_v41, 4 }
 0x6f3   : > { %2134 = vmatpush.bf16.msrb.mxu1 %v2107_v33 }
 0x6f4   : > { %v2524_v61 = vmax.f32 %v2522_v41, %v2523_v27 }
 0x6f6   : > { %v2525_v4 = vrot.slane %v2524_v61, 2 }
 0x6f7   : > { %2135 = vmatpush.bf16.msrb.mxu1 %v2106_v0 }
 0x6f8   : > { %v2526_v9 = vmax.f32 %v2524_v61, %v2525_v4 }
 0x6fa   : > { %v2527_v29 = vrot.slane %v2526_v9, 1 }
 0x6fb   : > { %2136 = vmatpush.bf16.msrb.mxu1 %v2105_v8 }
 0x6fc   : > { %v2528_v23 = vmax.f32 %v2526_v9, %v2527_v29 }
 0x6fe   : > { %v2565_v36 = vsel %vm2557_vm8, %v2528_v23, %v2564_v59 }
 0x6ff   : > { %2137 = vmatpush.bf16.msrb.mxu1 %v2104_v19 }
 0x703   : > { %2138 = vmatpush.bf16.msrb.mxu1 %v2103_v26 }
 0x707   : > { %2139 = vmatpush.bf16.msrb.mxu1 %v2102_v24 }
 0x70b   : > { %2140 = vmatpush.bf16.msrb.mxu1 %v2101_v16  ;;  %v2128_v13 = vpop.f32.mrf.mxu0 }
 0x70e   : > { %2141 = vmatmul.bf16.vlgmr.msrb.gmra.mxu1 %v3061_v32 }
 0x713   : > { %v2130_v54 = vpop.f32.mrf.mxu0 }
 0x78b   : > { %v2142_v56 = vpop.f32.mrf.mxu1 }
 0x78c   : > { %v2143_v20 = vadd.f32 %v2142_v56, %v2128_v13 }
 0x78e   : > { %v2159_v19 = vmul.f32 %v4096_v21, %v2143_v20 }
 0x790   : > { %2570 = vrot.lane.b32.xlu1 %v2159_v19, %s3440_s27 }
 0x793   : > { %v2144_v14 = vpop.f32.mrf.mxu1 }
 0x794   : > { %v2145_v26 = vadd.f32 %v2144_v14, %v2130_v54 }
 0x796   : > { %v2160_v39 = vmul.f32 %v4108_v43, %v2145_v26 }
 0x798   : > { %2572 = vrot.lane.b32.xlu2 %v2160_v39, %s3440_s27  ;;  %s2621_s27 = sshll.u32 %s539_s29, 4  ;;  %s2622_s27 = int_to_ptr.vmem [resolvable:$true] %s2621_s27 }
 0x7f2   : > { %v2573_v18 = vpop.permute.xlu2 %2572 }
 0x7f3   : > { %v2577_v16 = vsel %vm1308_vm1, %v2565_v36, %v2573_v18 }
 0x7f4   : > { %2579 = vst [vmem:[%s539_s29 + $0x8] sm:$0xff] %v2577_v16  ;;  %v2585_v21 = vmul.f32 %v3181_v31, %v2577_v16 }
 0x7f6   : > { %2588 = vadd.xlane.f32.xlu1 %v2585_v21 }
 0x802   : > { %v2571_v43 = vpop.permute.xlu1 %2570 }
 0x803   : > { %v2576_v17 = vsel %vm1308_vm1, %v4233_v5, %v2571_v43 }
 0x804   : > { %2578 = vst [vmem:[%s539_s29] sm:$0xff] %v2576_v17  ;;  %v2584_v24 = vmul.f32 %v3181_v31, %v2576_v17 }
 0x805   : > { %3402 = shalt.err (!%p3399_p4)
}
 0x806   : > { %s3441_s30 = smov 128   ;;  %s3442_s29 = smov 8   ;;  %2586 = vadd.xlane.f32.xlu0 %v2584_v24  ;;  %v3182_v5 = vld [vmem:[#allocation2] ss:$0 sm:$0xff]  ;;  %vm2596_vm9 = vcmask 7168  }
 0x807   : > { %3132 = dma.vmem_to_hbm [thread:$0]  (%p3559_p5), %s2622_s27, 256, %s2624_s3, %s2605_s19, %s3441_s30, %s3441_s30, %s3442_s29  }
 0x808   : > { %s576_s0 = scalar_lea.vmem %s4402_s13, %s4033_s28 }
 0x869   : > { %v2589_v45 = vpop.xlane.xlu1 %2588 }
 0x86a   : > { %v2595_v40 = vadd.f32 %v3182_v5, %v2589_v45 }
 0x86c   : > { %2598 = vst.msk [vmem:[%s576_s0 + $0x8] sm:$0xff] %vm2596_vm9, %v2595_v40 }
 0x879   : > { %v2587_v62 = vpop.xlane.xlu0 %2586 }
 0x87a   : > { %v2594_v44 = vadd.f32 %v3182_v5, %v2587_v62 }
 0x87c   : > { %2597 = vst.msk [vmem:[%s576_s0] sm:$0xff] %vm2596_vm9, %v2594_v44 }
 0x87d PF: > { %p3138_p7 = scmp.ge.s32.totalorder %s3437_s18, 2  ;;  %s2646_s24 = sand.u32 1, %s3425_s15  }
 0x87e   : > { %s2647_s3 = scalar_lea.sflag [#allocation4], %s2646_s24 }
 0x87f   : > { %p3135_p5 = pnand %p3138_p7, %p3563_p6 }
 0x881   : > { %p3136_p8 = pneg %p3135_p5 }
 0x883   : > { %3420 = dma.done.wait (%p3136_p8), %s2647_s3, 256  }
 0x884   : > { %3422 = vsyncadd (%p3136_p8), %s2647_s3, 4294967040  ;;  %p27_p9 = scmp.ge.s32.totalorder %s3546_s20, 10   ;;  %s4423_s15 = smov %s3429_s16 }
 0x885   : > { %s4424_s16 = smov %s3433_s17  ;;  %s4425_s17 = smov %s3557_s23 }
 0x886   : > { %s4426_s18 = smov %s3546_s20  ;;  %29 = sbr.rel (!%p27_p9) target bundleno = 10 (0xa), region = 131 }
 0x88b   :  { %2653 = vsyncpa [#allocation4], 1 }
 0x88c   :  { %2655 = vsyncpa [#allocation4 + $0x1], 1 }

</bundles_post_ra>
